<compile_context>
chip_gen: v6e
topology: v6e:2x2x1
jax: 0.10.0
libtpu: 0.0.40
codegen_flags: <defaults>
</compile_context>

<pallas_src>
import functools
from collections import Counter, defaultdict

import jax
import jax.numpy as jnp
import numpy as np
from jax import lax
from jax.experimental import pallas as pl
from jax.experimental.pallas import tpu as pltpu


def _ipow(x, n):
    """x**n (n: static positive python int) via exponentiation by squaring."""
    result = None
    base = x
    while n > 0:
        if n & 1:
            result = base if result is None else result * base
        n >>= 1
        if n:
            base = base * base
    return result


def _packet_reception_kernel(x_ref, out_ref, ext_ref, *, count_groups, max_off, window):
    # x_ref:   (S, D)          error probabilities, transposed so D is on the lane axis
    # out_ref: (S, Dout)       windowed means (transposed)
    # ext_ref: (S, D+max_off)  scratch: success probabilities, ones-extended on the right
    S, D = x_ref.shape
    Dout = D - window + 1

    # success probabilities, extended with ones so shifted lane reads stay in bounds
    ext_ref[:, pl.ds(0, D)] = 1.0 - x_ref[...].astype(jnp.float32)
    if max_off > 0:
        ext_ref[:, pl.ds(D, max_off)] = jnp.ones((S, max_off), jnp.float32)

    # product over all 8*packet_length shifted copies, grouped by identical multiplicity:
    #   receptions = prod_c ( prod_{o : count(o)==c} success_shifted_by_o ) ** c
    receptions = None
    for c, offs in count_groups:
        group = None
        for o in offs:
            factor = ext_ref[:, pl.ds(o, D)]   # == cat(success[:, o:], ones(S, o)) along lanes
            group = factor if group is None else group * factor
        term = _ipow(group, c)
        receptions = term if receptions is None else receptions * term

    # Sliding-window mean (unfold size=window, step=1) along the lane axis:
    #   window_sum_j = total - head_j - tail_j
    #     head_j = sum_{d <  j}          receptions[:, d]    (j in [0, Dout))
    #     tail_j = sum_{d >= j + window} receptions[:, d]
    # head/tail only touch the first Dout / last (D-window) columns -> tiny triangular matmuls.
    total = jnp.sum(receptions, axis=1, keepdims=True)                 # (S, 1)

    head_src = receptions[:, 0:Dout]                                   # (S, Dout)
    hr = lax.broadcasted_iota(jnp.int32, (Dout, Dout), 0)              # d index
    hc = lax.broadcasted_iota(jnp.int32, (Dout, Dout), 1)              # j index
    lower = jnp.where(hr < hc, 1.0, 0.0).astype(jnp.float32)
    head = jnp.dot(head_src, lower, preferred_element_type=jnp.float32)

    ntail = D - window                                                 # == Dout - 1
    if ntail > 0:
        tail_src = receptions[:, window:D]                             # (S, ntail)
        tr = lax.broadcasted_iota(jnp.int32, (ntail, Dout), 0)         # d - window
        tc = lax.broadcasted_iota(jnp.int32, (ntail, Dout), 1)         # j index
        upper = jnp.where(tr >= tc, 1.0, 0.0).astype(jnp.float32)
        tail = jnp.dot(tail_src, upper, preferred_element_type=jnp.float32)
        sums = total - head - tail
    else:
        sums = total - head

    out_ref[...] = (sums * (1.0 / window)).astype(out_ref.dtype)


def packet_reception_prob(error_props, packet_length=133, window=2000):
    D, S = error_props.shape
    assert D >= window, "need at least `window` datapoints (torch unfold size=2000)"
    # offset = int(4*k/500) for k in range(8*packet_length); multiplicity per distinct offset,
    # then group offsets that share the same multiplicity (exponent factoring).
    offsets = Counter(int(4 * k / 500) for k in range(8 * packet_length))
    max_off = max(offsets)
    groups = defaultdict(list)
    for o, c in offsets.items():
        groups[c].append(o)
    count_groups = tuple(sorted((c, tuple(sorted(os))) for c, os in groups.items()))
    Dout = D - window + 1

    kernel = functools.partial(
        _packet_reception_kernel,
        count_groups=count_groups, max_off=max_off, window=window,
    )
    out_t = pl.pallas_call(
        kernel,
        out_shape=jax.ShapeDtypeStruct((S, Dout), error_props.dtype),
        grid=(1,),
        in_specs=[pl.BlockSpec((S, D), lambda i: (0, 0))],
        out_specs=pl.BlockSpec((S, Dout), lambda i: (0, 0)),
        scratch_shapes=[pltpu.VMEM((S, D + max_off), jnp.float32)],
    )(error_props.T)                       # lane-dense working layout (S, D)
    return out_t.T                         # back to (Dout, S) as in the torch module


def reference(error_props, packet_length=133, window=2000):
    """Pure-JAX port of the torch forward (loop grouped by identical offsets)."""
    D, S = error_props.shape
    success = 1.0 - error_props
    receptions = jnp.ones_like(error_props)
    offsets = Counter(int(4 * k / 500) for k in range(8 * packet_length))
    for o, c in sorted(offsets.items()):
        padded = jnp.concatenate(
            [success[o:, :], jnp.ones((o, S), error_props.dtype)], axis=0
        )
        receptions = receptions * padded ** c
    windows = jnp.stack(
        [receptions[j : j + window] for j in range(D - window + 1)], axis=0
    )
    return jnp.mean(windows, axis=1)


if __name__ == "__main__":
    packet_length = 133
    window = 2000
    datapoints, sequences = 2100, 8  # smallest sensible shape given unfold(size=2000)

    key = jax.random.PRNGKey(0)
    error_props = jax.random.uniform(
        key, (datapoints, sequences), jnp.float32, minval=0.0, maxval=0.001
    )

    out = packet_reception_prob(error_props, packet_length, window)
    out = jax.block_until_ready(out)

    assert out.shape == (datapoints - window + 1, sequences)
    ref = jax.block_until_ready(reference(error_props, packet_length, window))
    np.testing.assert_allclose(np.asarray(out), np.asarray(ref), rtol=1e-3, atol=1e-6)

    print("KERNEL_OK")
</pallas_src>

<mosaic_0001>
module attributes {stable_mosaic.version = 11 : i64} {
  func.func @_packet_reception_kernel(%arg0: i32, %arg1: memref<8x2100xf32, #tpu.memory_space<vmem>>, %arg2: memref<8x101xf32, #tpu.memory_space<vmem>>, %arg3: memref<8x2108xf32, #tpu.memory_space<vmem>>) attributes {dimension_semantics = [#tpu.dimension_semantics<arbitrary>], iteration_bounds = array<i64: 1>, scalar_prefetch = 0 : i64, scratch_operands = 1 : i64, tpu.core_type = #tpu.core_type<tc>, window_params = [{pipeline_mode = #tpu.pipeline_mode<synchronous>, transform_indices = @transform_0, window_bounds = array<i64: 8, 2100>}, {pipeline_mode = #tpu.pipeline_mode<synchronous>, transform_indices = @transform_1, window_bounds = array<i64: 8, 101>}]} {
    %c0 = arith.constant 0 : index
    %c0_0 = arith.constant 0 : index
    %0 = vector.load %arg1[%c0, %c0_0] : memref<8x2100xf32, #tpu.memory_space<vmem>>, vector<8x2100xf32>
    %cst = arith.constant 1.000000e+00 : f32
    %1 = vector.broadcast %cst : f32 to vector<8x2100xf32>
    %2 = arith.subf %1, %0 : vector<8x2100xf32>
    %c0_1 = arith.constant 0 : index
    %c0_2 = arith.constant 0 : index
    %3 = vector.load %arg3[%c0_1, %c0_2] : memref<8x2108xf32, #tpu.memory_space<vmem>>, vector<8x2100xf32>
    tpu.vector_store %arg3[%c0_1, %c0_2], %2 {strides = array<i32>} : memref<8x2108xf32, #tpu.memory_space<vmem>>, vector<8x2100xf32>,
    %cst_3 = arith.constant 1.000000e+00 : f32
    %4 = vector.broadcast %cst_3 : f32 to vector<8x8xf32>
    %c0_4 = arith.constant 0 : index
    %c2100 = arith.constant 2100 : index
    %5 = vector.load %arg3[%c0_4, %c2100] : memref<8x2108xf32, #tpu.memory_space<vmem>>, vector<8x8xf32>
    tpu.vector_store %arg3[%c0_4, %c2100], %4 {strides = array<i32>} : memref<8x2108xf32, #tpu.memory_space<vmem>>, vector<8x8xf32>,
    %c0_5 = arith.constant 0 : index
    %c8 = arith.constant 8 : index
    %6 = vector.load %arg3[%c0_5, %c8] : memref<8x2108xf32, #tpu.memory_space<vmem>>, vector<8x2100xf32>
    %7 = arith.mulf %6, %6 : vector<8x2100xf32>
    %8 = arith.mulf %7, %7 : vector<8x2100xf32>
    %9 = arith.mulf %8, %8 : vector<8x2100xf32>
    %10 = arith.mulf %9, %9 : vector<8x2100xf32>
    %11 = arith.mulf %10, %10 : vector<8x2100xf32>
    %12 = arith.mulf %11, %11 : vector<8x2100xf32>
    %c0_6 = arith.constant 0 : index
    %c0_7 = arith.constant 0 : index
    %13 = vector.load %arg3[%c0_6, %c0_7] : memref<8x2108xf32, #tpu.memory_space<vmem>>, vector<8x2100xf32>
    %c0_8 = arith.constant 0 : index
    %c1 = arith.constant 1 : index
    %14 = vector.load %arg3[%c0_8, %c1] : memref<8x2108xf32, #tpu.memory_space<vmem>>, vector<8x2100xf32>
    %15 = arith.mulf %13, %14 : vector<8x2100xf32>
    %c0_9 = arith.constant 0 : index
    %c2 = arith.constant 2 : index
    %16 = vector.load %arg3[%c0_9, %c2] : memref<8x2108xf32, #tpu.memory_space<vmem>>, vector<8x2100xf32>
    %17 = arith.mulf %15, %16 : vector<8x2100xf32>
    %c0_10 = arith.constant 0 : index
    %c3 = arith.constant 3 : index
    %18 = vector.load %arg3[%c0_10, %c3] : memref<8x2108xf32, #tpu.memory_space<vmem>>, vector<8x2100xf32>
    %19 = arith.mulf %17, %18 : vector<8x2100xf32>
    %c0_11 = arith.constant 0 : index
    %c4 = arith.constant 4 : index
    %20 = vector.load %arg3[%c0_11, %c4] : memref<8x2108xf32, #tpu.memory_space<vmem>>, vector<8x2100xf32>
    %21 = arith.mulf %19, %20 : vector<8x2100xf32>
    %c0_12 = arith.constant 0 : index
    %c5 = arith.constant 5 : index
    %22 = vector.load %arg3[%c0_12, %c5] : memref<8x2108xf32, #tpu.memory_space<vmem>>, vector<8x2100xf32>
    %23 = arith.mulf %21, %22 : vector<8x2100xf32>
    %c0_13 = arith.constant 0 : index
    %c6 = arith.constant 6 : index
    %24 = vector.load %arg3[%c0_13, %c6] : memref<8x2108xf32, #tpu.memory_space<vmem>>, vector<8x2100xf32>
    %25 = arith.mulf %23, %24 : vector<8x2100xf32>
    %c0_14 = arith.constant 0 : index
    %c7 = arith.constant 7 : index
    %26 = vector.load %arg3[%c0_14, %c7] : memref<8x2108xf32, #tpu.memory_space<vmem>>, vector<8x2100xf32>
    %27 = arith.mulf %25, %26 : vector<8x2100xf32>
    %28 = arith.mulf %27, %27 : vector<8x2100xf32>
    %29 = arith.mulf %28, %28 : vector<8x2100xf32>
    %30 = arith.mulf %27, %29 : vector<8x2100xf32>
    %31 = arith.mulf %29, %29 : vector<8x2100xf32>
    %32 = arith.mulf %30, %31 : vector<8x2100xf32>
    %33 = arith.mulf %31, %31 : vector<8x2100xf32>
    %34 = arith.mulf %32, %33 : vector<8x2100xf32>
    %35 = arith.mulf %33, %33 : vector<8x2100xf32>
    %36 = arith.mulf %34, %35 : vector<8x2100xf32>
    %37 = arith.mulf %35, %35 : vector<8x2100xf32>
    %38 = arith.mulf %36, %37 : vector<8x2100xf32>
    %39 = arith.mulf %12, %38 : vector<8x2100xf32>
    %cst_15 = arith.constant dense<0.000000e+00> : vector<8xf32>
    %40 = vector.multi_reduction <add>, %39, %cst_15 [1] : vector<8x2100xf32> to vector<8xf32>
    %41 = vector.shape_cast %40 : vector<8xf32> to vector<8x1xf32>
    %42 = vector.extract_strided_slice %39 {offsets = [0, 0], sizes = [8, 101], strides = [1, 1]} : vector<8x2100xf32> to vector<8x101xf32>
    %43 = tpu.iota {dimensions = array<i32: 0>} : vector<101x101xi32>
    %44 = tpu.iota {dimensions = array<i32: 1>} : vector<101x101xi32>
    %45 = arith.cmpi slt, %43, %44 : vector<101x101xi32>
    %cst_16 = arith.constant 1.000000e+00 : f32
    %cst_17 = arith.constant 0.000000e+00 : f32
    %46 = vector.broadcast %cst_16 : f32 to vector<101x101xf32>
    %47 = vector.broadcast %cst_17 : f32 to vector<101x101xf32>
    %48 = arith.select %45, %46, %47 : vector<101x101xi1>, vector<101x101xf32>
    %cst_18 = arith.constant dense<0.000000e+00> : vector<8x101xf32>
    %49 = tpu.matmul %42, %48, %cst_18 {dimension_numbers = #tpu.dot_dimension_numbers<[1], [0], [0], [1], [0, 0, 1, 1], [], []>} : vector<8x101xf32>, vector<101x101xf32>, vector<8x101xf32> -> vector<8x101xf32>
    %50 = vector.extract_strided_slice %39 {offsets = [0, 2000], sizes = [8, 100], strides = [1, 1]} : vector<8x2100xf32> to vector<8x100xf32>
    %51 = tpu.iota {dimensions = array<i32: 0>} : vector<100x101xi32>
    %52 = tpu.iota {dimensions = array<i32: 1>} : vector<100x101xi32>
    %53 = arith.cmpi sge, %51, %52 : vector<100x101xi32>
    %cst_19 = arith.constant 1.000000e+00 : f32
    %cst_20 = arith.constant 0.000000e+00 : f32
    %54 = vector.broadcast %cst_19 : f32 to vector<100x101xf32>
    %55 = vector.broadcast %cst_20 : f32 to vector<100x101xf32>
    %56 = arith.select %53, %54, %55 : vector<100x101xi1>, vector<100x101xf32>
    %cst_21 = arith.constant dense<0.000000e+00> : vector<8x101xf32>
    %57 = tpu.matmul %50, %56, %cst_21 {dimension_numbers = #tpu.dot_dimension_numbers<[1], [0], [0], [1], [0, 0, 1, 1], [], []>} : vector<8x100xf32>, vector<100x101xf32>, vector<8x101xf32> -> vector<8x101xf32>
    %58 = vector.broadcast %41 : vector<8x1xf32> to vector<8x101xf32>
    %59 = arith.subf %58, %49 : vector<8x101xf32>
    %60 = arith.subf %59, %57 : vector<8x101xf32>
    %cst_22 = arith.constant 5.000000e-04 : f32
    %61 = vector.broadcast %cst_22 : f32 to vector<8x101xf32>
    %62 = arith.mulf %60, %61 : vector<8x101xf32>
    %c0_23 = arith.constant 0 : index
    %c0_24 = arith.constant 0 : index
    %63 = vector.load %arg2[%c0_23, %c0_24] : memref<8x101xf32, #tpu.memory_space<vmem>>, vector<8x101xf32>
    tpu.vector_store %arg2[%c0_23, %c0_24], %62 {strides = array<i32>} : memref<8x101xf32, #tpu.memory_space<vmem>>, vector<8x101xf32>,
    return
  }
  func.func @transform_0(%arg0: i32) -> (i32, i32) {
    %c0_i32 = arith.constant 0 : i32
    %c0_i32_0 = arith.constant 0 : i32
    %c0_i32_1 = arith.constant 0 : i32
    return %c0_i32, %c0_i32_0 : i32, i32
  }
  func.func @transform_1(%arg0: i32) -> (i32, i32) {
    %c0_i32 = arith.constant 0 : i32
    %c0_i32_0 = arith.constant 0 : i32
    %c0_i32_1 = arith.constant 0 : i32
    return %c0_i32, %c0_i32_0 : i32, i32
  }
}

</mosaic_0001>

<bundles_post_ra>
// kernel: tpu_custom_call.1
= control target key start
LH: loop header
LB: loop body
LE: loop exit
PB: predicated region body
PF: predicated region fallthrough
CT: control target
= control target key end

     0   :  { %6 = vsyncpa [#allocation4], 0  ;;  %s2682_s0 = inlined_call_operand.hbm [shape: f32[8,2100], index: 0, kind: input, shape index: {}]   ;;  %s2683_s1 = inlined_call_operand.hbm [shape: f32[8,101], index: 1, kind: output, shape index: {}]  }
   0x1   :  { %7 = vsyncpa [#allocation5], 0  ;;  %s1633_s6 = smov [#allocation3]  }
   0x2   :  { %s14_s7 = sshll.u32 %s1633_s6, 4  ;;  %s15_s7 = int_to_ptr.vmem [resolvable:$true] %s14_s7 }
   0x3   :  { %s1597_s8 = scalar_lea.vmem %s15_s7, 2176  ;;  %p1602_p1 = scmp.lt.s32.totalorder %s15_s7, %s15_s7 }
   0x4   :  { %p1598_p0 = scmp.ne.s32.totalorder %s15_s7, %s1597_s8  ;;  %p1603_p2 = scmp.lt.s32.totalorder %s1597_s8, %s1597_s8 }
   0x6   :  { %p1604_p3 = por %p1603_p2, %p1602_p1 }
   0x8   :  { %p1605_p4 = pnand %p1604_p3, %p1598_p0 }
   0xa   :  { %1608 = shalt.err (!%p1605_p4)
}
   0xb   :  { %17 = dma.hbm_to_vmem [thread:$0]  %s2682_s0, 2176, %s15_s7, [#allocation4]  }
   0xc   :  { %1629 = dma.done.wait [#allocation4], 2176  }
   0xd   :  { %1630 = vsyncadd [#allocation4], 4294965120  ;;  %v35_v0 = vld [vmem:[#allocation3 + $0x70] sm:$0xff]  ;;  %v21_v1 = vld [vmem:[#allocation3] sm:$0xff]  ;;  %vm71_vm0 = vcmask 424960   ;;  %vm73_vm1 = vcmask 490912  }
   0xe   :  { %v36_v2 = vld [vmem:[#allocation3 + $0x78] sm:$0xff]  ;;  %v1661_v3 = vsub.f32 1.0, %v35_v0  ;;  %v1663_v4 = vsub.f32 1.0, %v21_v1  ;;  %v22_v6 = vld [vmem:[#allocation3 + $0x8] sm:$0xff]  ;;  %v37_v7 = vld [vmem:[#allocation3 + $0x80] sm:$0xff]  ;;  %s1634_s0 = smov 127  }
   0xf   :  { %v1665_v5 = vsub.f32 1.0, %v36_v2  ;;  %v23_v8 = vld [vmem:[#allocation3 + $0x10] sm:$0xff]  ;;  %v1667_v9 = vsub.f32 1.0, %v22_v6  ;;  %v54_v10 = vsub.f32 1.0, %v37_v7  ;;  %v25_v12 = vld [vmem:[#allocation3 + $0x20] sm:$0xff]  ;;  %v24_v13 = vld [vmem:[#allocation3 + $0x18] sm:$0xff] }
  0x10   :  { %v1669_v11 = vsub.f32 1.0, %v23_v8  ;;  %v26_v14 = vld [vmem:[#allocation3 + $0x28] sm:$0xff]  ;;  %69 = vst [vmem:[#allocation2 + $0x70] sm:$0xff] %v1661_v3  ;;  %239 = vrot.lane.b32.xlu1 %v1661_v3, %s1634_s0  ;;  %211 = vrot.lane.b32.xlu0 %v1663_v4, %s1634_s0  ;;  %v1676_v15 = vsub.f32 1.0, %v25_v12  ;;  %v1678_v16 = vsub.f32 1.0, %v24_v13  ;;  %v27_v18 = vld [vmem:[#allocation3 + $0x30] sm:$0xff] }
  0x11   :  { %v1680_v17 = vsub.f32 1.0, %v26_v14  ;;  %v28_v19 = vld [vmem:[#allocation3 + $0x38] sm:$0xff]  ;;  %v29_v20 = vld [vmem:[#allocation3 + $0x40] sm:$0xff]  ;;  %56 = vst [vmem:[#allocation2 + $0x8] sm:$0xff] %v1667_v9  ;;  %72 = vst.msk [vmem:[#allocation2 + $0x80] sm:$0xff] %vm71_vm0, %v54_v10  ;;  %v1685_v21 = vsub.f32 1.0, %v27_v18 }
  0x12   :  { %57 = vst [vmem:[#allocation2 + $0x10] sm:$0xff] %v1669_v11  ;;  %v1687_v22 = vsub.f32 1.0, %v28_v19  ;;  %v1689_v23 = vsub.f32 1.0, %v29_v20  ;;  %v30_v24 = vld [vmem:[#allocation3 + $0x48] sm:$0xff]  ;;  %v2684_v25 = vmov 1.0   ;;  %59 = vst [vmem:[#allocation2 + $0x20] sm:$0xff] %v1676_v15 }
  0x13   :  { %74 = vst.msk [vmem:[#allocation2 + $0x80] sm:$0xff] %vm73_vm1, %v2684_v25  ;;  %58 = vst [vmem:[#allocation2 + $0x18] sm:$0xff] %v1678_v16  ;;  %v1696_v26 = vsub.f32 1.0, %v30_v24  ;;  %s1636_s11 = smov 126   ;;  %v31_v27 = vld [vmem:[#allocation3 + $0x50] sm:$0xff]  ;;  %s1637_s12 = smov 125  }
  0x14   :  { %60 = vst [vmem:[#allocation2 + $0x28] sm:$0xff] %v1680_v17  ;;  %61 = vst [vmem:[#allocation2 + $0x30] sm:$0xff] %v1685_v21  ;;  %241 = vrot.lane.b32.xlu1 %v1665_v5, %s1634_s0  ;;  %213 = vrot.lane.b32.xlu0 %v1667_v9, %s1634_s0  ;;  %v1710_v28 = vsub.f32 1.0, %v31_v27  ;;  %s1638_s13 = smov 124   ;;  %s1639_s14 = smov 123   ;;  %v32_v30 = vld [vmem:[#allocation3 + $0x58] sm:$0xff] }
  0x15   :  { %62 = vst [vmem:[#allocation2 + $0x38] sm:$0xff] %v1687_v22  ;;  %63 = vst [vmem:[#allocation2 + $0x40] sm:$0xff] %v1689_v23  ;;  %s1640_s15 = smov 122   ;;  %v1755_v31 = vsub.f32 1.0, %v32_v30  ;;  %s1641_s16 = smov 121   ;;  %v33_v32 = vld [vmem:[#allocation3 + $0x60] sm:$0xff] }
  0x16   :  { %64 = vst [vmem:[#allocation2 + $0x48] sm:$0xff] %v1696_v26  ;;  %65 = vst [vmem:[#allocation2 + $0x50] sm:$0xff] %v1710_v28  ;;  %v1798_v33 = vsub.f32 1.0, %v33_v32  ;;  %v34_v34 = vld [vmem:[#allocation3 + $0x68] sm:$0xff]  ;;  %vm245_vm2 = vcmask 1039360   ;;  %vm330_vm3 = vcmask 1031168  }
  0x17   :  { %66 = vst [vmem:[#allocation2 + $0x58] sm:$0xff] %v1755_v31  ;;  %v1813_v35 = vsub.f32 1.0, %v34_v34  ;;  %vm415_vm4 = vcmask 1022976   ;;  %vm500_vm5 = vcmask 1014784   ;;  %vm585_vm6 = vcmask 1006592   ;;  %s1642_s17 = smov 8  }
  0x18   :  { %296 = vrot.lane.b32.xlu1 %v1663_v4, %s1636_s11  ;;  %298 = vrot.lane.b32.xlu0 %v1667_v9, %s1636_s11  ;;  %67 = vst [vmem:[#allocation2 + $0x60] sm:$0xff] %v1798_v33  ;;  %vm670_vm7 = vcmask 998400   ;;  %vm755_vm8 = vcmask 990208   ;;  %vm1244_vm10 = vcmask 1044480   ;;  %vm1353_vm1 = vcmask 1043456   ;;  %s1645_s18 = smov 120  }
  0x19   :  { %68 = vst [vmem:[#allocation2 + $0x68] sm:$0xff] %v1813_v35  ;;  %s1646_s19 = smov 40   ;;  %s1647_s20 = smov [#allocation6]  }
  0x1a   :  { %v1717_v29 = vld [vmem:[#allocation2 + $0x80] sm:$0xff]  ;;  %s1437_s21 = sshll.u32 %s1647_s20, 4  ;;  %s1438_s21 = int_to_ptr.vmem [resolvable:$true] %s1437_s21 }
  0x1b   :  { %s1609_s22 = scalar_lea.vmem %s1438_s21, 128  ;;  %p1614_p6 = scmp.lt.s32.totalorder %s1438_s21, %s1438_s21 }
  0x1c   :  { %324 = vrot.lane.b32.xlu1 %v1661_v3, %s1636_s11  ;;  %326 = vrot.lane.b32.xlu0 %v1665_v5, %s1636_s11  ;;  %p1610_p5 = scmp.ne.s32.totalorder %s1438_s21, %s1609_s22  ;;  %p1615_p7 = scmp.lt.s32.totalorder %s1609_s22, %s1609_s22 }
  0x1e   :  { %p1616_p8 = por %p1615_p7, %p1614_p6 }
  0x20   :  { %328 = vrot.lane.b32.xlu1 %v1717_v29, %s1636_s11  ;;  %243 = vrot.lane.b32.xlu0 %v1717_v29, %s1634_s0  ;;  %p1617_p9 = pnand %p1616_p8, %p1610_p5 }
  0x24   :  { %383 = vrot.lane.b32.xlu1 %v1667_v9, %s1637_s12  ;;  %381 = vrot.lane.b32.xlu0 %v1663_v4, %s1637_s12 }
  0x28   :  { %411 = vrot.lane.b32.xlu1 %v1665_v5, %s1637_s12  ;;  %409 = vrot.lane.b32.xlu0 %v1661_v3, %s1637_s12 }
  0x2c   :  { %466 = vrot.lane.b32.xlu1 %v1663_v4, %s1638_s13  ;;  %413 = vrot.lane.b32.xlu0 %v1717_v29, %s1637_s12 }
  0x30   :  { %494 = vrot.lane.b32.xlu1 %v1661_v3, %s1638_s13  ;;  %468 = vrot.lane.b32.xlu0 %v1667_v9, %s1638_s13 }
  0x34   :  { %498 = vrot.lane.b32.xlu1 %v1717_v29, %s1638_s13  ;;  %496 = vrot.lane.b32.xlu0 %v1665_v5, %s1638_s13 }
  0x38   :  { %553 = vrot.lane.b32.xlu1 %v1667_v9, %s1639_s14  ;;  %551 = vrot.lane.b32.xlu0 %v1663_v4, %s1639_s14 }
  0x3c   :  { %581 = vrot.lane.b32.xlu1 %v1665_v5, %s1639_s14  ;;  %579 = vrot.lane.b32.xlu0 %v1661_v3, %s1639_s14 }
  0x40   :  { %636 = vrot.lane.b32.xlu1 %v1663_v4, %s1640_s15  ;;  %583 = vrot.lane.b32.xlu0 %v1717_v29, %s1639_s14 }
  0x44   :  { %664 = vrot.lane.b32.xlu1 %v1661_v3, %s1640_s15  ;;  %638 = vrot.lane.b32.xlu0 %v1667_v9, %s1640_s15 }
  0x48   :  { %668 = vrot.lane.b32.xlu1 %v1717_v29, %s1640_s15  ;;  %666 = vrot.lane.b32.xlu0 %v1665_v5, %s1640_s15 }
  0x4c   :  { %723 = vrot.lane.b32.xlu1 %v1667_v9, %s1641_s16  ;;  %721 = vrot.lane.b32.xlu0 %v1663_v4, %s1641_s16 }
  0x50   :  { %751 = vrot.lane.b32.xlu1 %v1665_v5, %s1641_s16  ;;  %749 = vrot.lane.b32.xlu0 %v1661_v3, %s1641_s16 }
  0x54   :  { %215 = vrot.lane.b32.xlu1 %v1669_v11, %s1634_s0  ;;  %753 = vrot.lane.b32.xlu0 %v1717_v29, %s1641_s16 }
  0x58   :  { %219 = vrot.lane.b32.xlu1 %v1676_v15, %s1634_s0  ;;  %217 = vrot.lane.b32.xlu0 %v1678_v16, %s1634_s0 }
  0x5c   :  { %302 = vrot.lane.b32.xlu1 %v1678_v16, %s1636_s11  ;;  %300 = vrot.lane.b32.xlu0 %v1669_v11, %s1636_s11 }
  0x60   :  { %304 = vrot.lane.b32.xlu1 %v1676_v15, %s1636_s11  ;;  %221 = vrot.lane.b32.xlu0 %v1680_v17, %s1634_s0 }
  0x64   :  { %387 = vrot.lane.b32.xlu1 %v1678_v16, %s1637_s12  ;;  %385 = vrot.lane.b32.xlu0 %v1669_v11, %s1637_s12 }
  0x68   :  { %306 = vrot.lane.b32.xlu1 %v1680_v17, %s1636_s11  ;;  %223 = vrot.lane.b32.xlu0 %v1685_v21, %s1634_s0 }
  0x6c   :  { %470 = vrot.lane.b32.xlu1 %v1669_v11, %s1638_s13  ;;  %389 = vrot.lane.b32.xlu0 %v1676_v15, %s1637_s12 }
  0x70   :  { %225 = vrot.lane.b32.xlu1 %v1687_v22, %s1634_s0  ;;  %472 = vrot.lane.b32.xlu0 %v1678_v16, %s1638_s13 }
  0x74   :  { %391 = vrot.lane.b32.xlu1 %v1680_v17, %s1637_s12  ;;  %308 = vrot.lane.b32.xlu0 %v1685_v21, %s1636_s11 }
  0x78   :  { %555 = vrot.lane.b32.xlu1 %v1669_v11, %s1639_s14  ;;  %474 = vrot.lane.b32.xlu0 %v1676_v15, %s1638_s13 }
  0x7c   :  { %227 = vrot.lane.b32.xlu1 %v1689_v23, %s1634_s0  ;;  %557 = vrot.lane.b32.xlu0 %v1678_v16, %s1639_s14 }
  0x80   :  { %393 = vrot.lane.b32.xlu1 %v1685_v21, %s1637_s12  ;;  %310 = vrot.lane.b32.xlu0 %v1687_v22, %s1636_s11 }
  0x82   :  { %v1828_v36 = vpop.permute.xlu1 %239  ;;  %v212_v37 = vpop.permute.xlu0 %211 }
  0x83   :  { %2694 = vst [vmem:[#allocation9_spill] sm:$0xff] %v1828_v36 }
  0x84   :  { %559 = vrot.lane.b32.xlu1 %v1676_v15, %s1639_s14  ;;  %476 = vrot.lane.b32.xlu0 %v1680_v17, %s1638_s13 }
  0x86   :  { %v242_v38 = vpop.permute.xlu1 %241  ;;  %v1834_v39 = vpop.permute.xlu0 %213 }
  0x87   :  { %v246_v60 = vsel %vm245_vm2, %v212_v37, %v1834_v39  ;;  %v260_v1 = vsel %vm245_vm2, %v1828_v36, %v242_v38 }
  0x88   :  { %642 = vrot.lane.b32.xlu1 %v1678_v16, %s1640_s15  ;;  %640 = vrot.lane.b32.xlu0 %v1669_v11, %s1640_s15  ;;  %v279_v0 = vmul.f32 %v246_v60, %v1663_v4  ;;  %v293_v13 = vmul.f32 %v260_v1, %v1661_v3 }
  0x8a   :  { %v297_v40 = vpop.permute.xlu1 %296  ;;  %v1840_v41 = vpop.permute.xlu0 %298 }
  0x8b   :  { %v331_v63 = vsel %vm330_vm3, %v297_v40, %v1840_v41 }
  0x8c   :  { %312 = vrot.lane.b32.xlu1 %v1689_v23, %s1636_s11  ;;  %229 = vrot.lane.b32.xlu0 %v1696_v26, %s1634_s0  ;;  %v364_v6 = vmul.f32 %v331_v63, %v279_v0 }
  0x8e   :  { %v1846_v42 = vpop.permute.xlu1 %324  ;;  %v1848_v43 = vpop.permute.xlu0 %326 }
  0x8f   :  { %2695 = vst [vmem:[#allocation10_spill] sm:$0xff] %v1846_v42  ;;  %v345_v10 = vsel %vm330_vm3, %v1846_v42, %v1848_v43 }
  0x90   :  { %478 = vrot.lane.b32.xlu1 %v1685_v21, %s1638_s13  ;;  %395 = vrot.lane.b32.xlu0 %v1687_v22, %s1637_s12  ;;  %v378_v24 = vmul.f32 %v345_v10, %v293_v13 }
  0x92   :  { %v1854_v44 = vpop.permute.xlu1 %328  ;;  %v244_v45 = vpop.permute.xlu0 %243 }
  0x93   :  { %v261_v14 = vsel %vm245_vm2, %v242_v38, %v244_v45  ;;  %v295_v18 = vmul.f32 %v244_v45, %v1717_v29 }
  0x94   :  { %644 = vrot.lane.b32.xlu1 %v1676_v15, %s1640_s15  ;;  %561 = vrot.lane.b32.xlu0 %v1680_v17, %s1639_s14  ;;  %v294_v34 = vmul.f32 %v261_v14, %v1665_v5 }
  0x95   :  { %v380_v45 = vmul.f32 %v1854_v44, %v295_v18 }
  0x96   :  { %v1860_v46 = vpop.permute.xlu1 %383  ;;  %v382_v47 = vpop.permute.xlu0 %381 }
  0x97   :  { %v416_v2 = vsel %vm415_vm4, %v382_v47, %v1860_v46 }
  0x98   :  { %727 = vrot.lane.b32.xlu1 %v1678_v16, %s1641_s16  ;;  %725 = vrot.lane.b32.xlu0 %v1669_v11, %s1641_s16 }
  0x9a   :  { %v412_v48 = vpop.permute.xlu1 %411  ;;  %v1866_v49 = vpop.permute.xlu0 %409 }
  0x9b   :  { %2696 = vst [vmem:[#allocation11_spill] sm:$0xff] %v1866_v49  ;;  %v430_v19 = vsel %vm415_vm4, %v1866_v49, %v412_v48 }
  0x9c   :  { %314 = vrot.lane.b32.xlu1 %v1696_v26, %s1636_s11  ;;  %231 = vrot.lane.b32.xlu0 %v1710_v28, %s1634_s0  ;;  %v463_v38 = vmul.f32 %v430_v19, %v378_v24 }
  0x9e   :  { %v467_v50 = vpop.permute.xlu1 %466  ;;  %v414_v51 = vpop.permute.xlu0 %413 }
  0xa0   :  { %480 = vrot.lane.b32.xlu1 %v1687_v22, %s1638_s13  ;;  %397 = vrot.lane.b32.xlu0 %v1689_v23, %s1637_s12 }
  0xa2   :  { %v1876_v52 = vpop.permute.xlu1 %494  ;;  %v1878_v53 = vpop.permute.xlu0 %468 }
  0xa3   :  { %2697 = vst [vmem:[#allocation12_spill] sm:$0xff] %v1876_v52  ;;  %v501_v12 = vsel %vm500_vm5, %v467_v50, %v1878_v53  ;;  %v346_v50 = vsel %vm330_vm3, %v1848_v43, %v1854_v44 }
  0xa4   :  { %646 = vrot.lane.b32.xlu1 %v1680_v17, %s1640_s15  ;;  %563 = vrot.lane.b32.xlu0 %v1685_v21, %s1639_s14 }
  0xa6   :  { %v499_v54 = vpop.permute.xlu1 %498  ;;  %v497_v55 = vpop.permute.xlu0 %496 }
  0xa7   :  { %v515_v3 = vsel %vm500_vm5, %v1876_v52, %v497_v55 }
  0xa8   :  { %729 = vrot.lane.b32.xlu0 %v1676_v15, %s1641_s16  ;;  %233 = vrot.lane.b32.xlu1 %v1755_v31, %s1634_s0  ;;  %v449_v15 = vmul.f32 %v416_v2, %v364_v6  ;;  %v548_v60 = vmul.f32 %v515_v3, %v463_v38  ;;  %v465_v2 = vmul.f32 %v414_v51, %v380_v45 }
  0xaa   :  { %v1888_v56 = vpop.permute.xlu1 %553  ;;  %v552_v57 = vpop.permute.xlu0 %551  ;;  %v534_v27 = vmul.f32 %v501_v12, %v449_v15  ;;  %v516_v12 = vsel %vm500_vm5, %v497_v55, %v499_v54  ;;  %v550_v44 = vmul.f32 %v499_v54, %v465_v2 }
  0xab   :  { %v586_v20 = vsel %vm585_vm6, %v552_v57, %v1888_v56  ;;  %v431_v57 = vsel %vm415_vm4, %v412_v48, %v414_v51 }
  0xac   :  { %v619_v40 = vmul.f32 %v586_v20, %v534_v27 }
  0xae   :  { %v582_v58 = vpop.permute.xlu1 %581  ;;  %v1890_v59 = vpop.permute.xlu0 %579 }
  0xaf   :  { %2698 = vst [vmem:[#allocation13_spill] sm:$0xff] %v1890_v59  ;;  %v600_v47 = vsel %vm585_vm6, %v1890_v59, %v582_v58 }
  0xb0   :  { %v633_v13 = vmul.f32 %v600_v47, %v548_v60 }
  0xb2   :  { %v637_v61 = vpop.permute.xlu1 %636  ;;  %v584_v62 = vpop.permute.xlu0 %583 }
  0xb3   :  { %v601_v48 = vsel %vm585_vm6, %v582_v58, %v584_v62  ;;  %v635_v24 = vmul.f32 %v584_v62, %v550_v44 }
  0xb6   :  { %v1901_v7 = vpop.permute.xlu1 %664  ;;  %v1903_v8 = vpop.permute.xlu0 %638 }
  0xb7   :  { %2699 = vst [vmem:[#allocation14_spill] sm:$0xff] %v1901_v7  ;;  %v671_v37 = vsel %vm670_vm7, %v637_v61, %v1903_v8  ;;  %v379_v61 = vmul.f32 %v346_v50, %v294_v34 }
  0xb8   :  { %v704_v63 = vmul.f32 %v671_v37, %v619_v40 }
  0xb9   :  { %v464_v43 = vmul.f32 %v431_v57, %v379_v61 }
  0xba   :  { %v669_v30 = vpop.permute.xlu1 %668  ;;  %v667_v32 = vpop.permute.xlu0 %666 }
  0xbb   :  { %v685_v6 = vsel %vm670_vm7, %v1901_v7, %v667_v32  ;;  %v549_v51 = vmul.f32 %v516_v12, %v464_v43  ;;  %v686_v34 = vsel %vm670_vm7, %v667_v32, %v669_v30  ;;  %v720_v38 = vmul.f32 %v669_v30, %v635_v24 }
  0xbc   :  { %v718_v15 = vmul.f32 %v685_v6, %v633_v13 }
  0xbd   :  { %v634_v37 = vmul.f32 %v601_v48, %v549_v51 }
  0xbe   :  { %v1929_v0 = vpop.permute.xlu1 %723  ;;  %v722_v1 = vpop.permute.xlu0 %721 }
  0xbf   :  { %v756_v10 = vsel %vm755_vm8, %v722_v1, %v1929_v0  ;;  %v719_v50 = vmul.f32 %v686_v34, %v634_v37 }
  0xc0   :  { %v789_v14 = vmul.f32 %v756_v10, %v704_v63 }
  0xc2   :  { %v806_v18 = vmul.f32 %v789_v14, %v789_v14  ;;  %v752_v19 = vpop.permute.xlu1 %751  ;;  %v1937_v20 = vpop.permute.xlu0 %749 }
  0xc3   :  { %2700 = vst [vmem:[#allocation15_spill] sm:$0xff] %v1937_v20  ;;  %v770_v27 = vsel %vm755_vm8, %v1937_v20, %v752_v19 }
  0xc4   :  { %v823_v3 = vmul.f32 %v806_v18, %v806_v18  ;;  %v803_v55 = vmul.f32 %v770_v27, %v718_v15 }
  0xc6   :  { %v840_v40 = vmul.f32 %v823_v3, %v789_v14  ;;  %v857_v54 = vmul.f32 %v823_v3, %v823_v3  ;;  %v820_v45 = vmul.f32 %v803_v55, %v803_v55  ;;  %v1942_v58 = vpop.permute.xlu1 %215  ;;  %v754_v47 = vpop.permute.xlu0 %753 }
  0xc7   :  { %v771_v57 = vsel %vm755_vm8, %v752_v19, %v754_v47  ;;  %v805_v60 = vmul.f32 %v754_v47, %v720_v38 }
  0xc8   :  { %v874_v62 = vmul.f32 %v857_v54, %v840_v40  ;;  %v891_v63 = vmul.f32 %v857_v54, %v857_v54  ;;  %v837_v1 = vmul.f32 %v820_v45, %v820_v45  ;;  %v804_v61 = vmul.f32 %v771_v57, %v719_v50 }
  0xc9   :  { %v822_v2 = vmul.f32 %v805_v60, %v805_v60 }
  0xca   :  { %v854_v32 = vmul.f32 %v837_v1, %v803_v55  ;;  %v871_v6 = vmul.f32 %v837_v1, %v837_v1  ;;  %v1945_v10 = vpop.permute.xlu1 %219  ;;  %v1947_v30 = vpop.permute.xlu0 %217  ;;  %v908_v12 = vmul.f32 %v891_v63, %v874_v62  ;;  %v925_v13 = vmul.f32 %v891_v63, %v891_v63 }
  0xcb   :  { %v821_v14 = vmul.f32 %v804_v61, %v804_v61  ;;  %v839_v43 = vmul.f32 %v822_v2, %v822_v2 }
  0xcc   :  { %v888_v44 = vmul.f32 %v871_v6, %v854_v32  ;;  %v942_v48 = vmul.f32 %v925_v13, %v908_v12  ;;  %v959_v51 = vmul.f32 %v925_v13, %v925_v13  ;;  %v905_v34 = vmul.f32 %v871_v6, %v871_v6 }
  0xcd   :  { %v838_v15 = vmul.f32 %v821_v14, %v821_v14  ;;  %v856_v18 = vmul.f32 %v839_v43, %v805_v60  ;;  %v873_v19 = vmul.f32 %v839_v43, %v839_v43 }
  0xce   :  { %v1949_v24 = vpop.permute.xlu1 %302  ;;  %v1951_v27 = vpop.permute.xlu0 %300  ;;  %v976_v38 = vmul.f32 %v959_v51, %v942_v48  ;;  %v922_v40 = vmul.f32 %v905_v34, %v888_v44  ;;  %v939_v45 = vmul.f32 %v905_v34, %v905_v34 }
  0xcf   :  { %v855_v3 = vmul.f32 %v838_v15, %v804_v61  ;;  %v872_v55 = vmul.f32 %v838_v15, %v838_v15  ;;  %v890_v37 = vmul.f32 %v873_v19, %v856_v18  ;;  %v907_v47 = vmul.f32 %v873_v19, %v873_v19 }
  0xd0   :  { %1010 = vrot.lane.b32.xlu1 %v976_v38, %s1642_s17  ;;  %v956_v62 = vmul.f32 %v939_v45, %v922_v40  ;;  %v973_v63 = vmul.f32 %v939_v45, %v939_v45 }
  0xd1   :  { %v889_v54 = vmul.f32 %v872_v55, %v855_v3  ;;  %v906_v60 = vmul.f32 %v872_v55, %v872_v55  ;;  %v924_v1 = vmul.f32 %v907_v47, %v890_v37  ;;  %v941_v2 = vmul.f32 %v907_v47, %v907_v47 }
  0xd2   :  { %v1954_v50 = vpop.permute.xlu1 %304  ;;  %v1956_v57 = vpop.permute.xlu0 %221  ;;  %v990_v61 = vmul.f32 %v973_v63, %v956_v62 }
  0xd3   :  { %v923_v32 = vmul.f32 %v906_v60, %v889_v54  ;;  %v940_v6 = vmul.f32 %v906_v60, %v906_v60  ;;  %v958_v14 = vmul.f32 %v941_v2, %v924_v1  ;;  %v975_v43 = vmul.f32 %v941_v2, %v941_v2 }
  0xd4   :  { %1038 = vrot.lane.b32.xlu0 %v990_v61, %s1642_s17 }
  0xd5   :  { %v957_v44 = vmul.f32 %v940_v6, %v923_v32  ;;  %v974_v48 = vmul.f32 %v940_v6, %v940_v6  ;;  %v992_v15 = vmul.f32 %v975_v43, %v958_v14 }
  0xd6   :  { %v1958_v12 = vpop.permute.xlu1 %387  ;;  %v1960_v13 = vpop.permute.xlu0 %385 }
  0xd7   :  { %v991_v18 = vmul.f32 %v974_v48, %v957_v44 }
  0xd8   :  { %1042 = vrot.lane.b32.xlu0 %v992_v15, %s1642_s17 }
  0xd9   :  { %1040 = vrot.lane.b32.xlu1 %v991_v18, %s1642_s17 }
  0xda   :  { %v1963_v19 = vpop.permute.xlu1 %306  ;;  %v1965_v51 = vpop.permute.xlu0 %223 }
  0xdc   :  { %316 = vrot.lane.b32.xlu0 %v1710_v28, %s1636_s11 }
  0xdd   :  { %399 = vrot.lane.b32.xlu1 %v1696_v26, %s1637_s12 }
  0xde   :  { %v1969_v34 = vpop.permute.xlu1 %470  ;;  %v1971_v3 = vpop.permute.xlu0 %389 }
  0xe0   :  { %482 = vrot.lane.b32.xlu0 %v1689_v23, %s1638_s13 }
  0xe1   :  { %565 = vrot.lane.b32.xlu1 %v1687_v22, %s1639_s14 }
  0xe2   :  { %v226_v55 = vpop.permute.xlu1 %225  ;;  %v1977_v37 = vpop.permute.xlu0 %472 }
  0xe3   :  { %v252_v15 = vsel %vm245_vm2, %v1965_v51, %v226_v55 }
  0xe4   :  { %648 = vrot.lane.b32.xlu0 %v1685_v21, %s1640_s15  ;;  %v285_v25 = vmul.f32 %v252_v15, %v1685_v21 }
  0xe5   :  { %731 = vrot.lane.b32.xlu1 %v1680_v17, %s1641_s16 }
  0xe6   :  { %v1983_v38 = vpop.permute.xlu1 %391  ;;  %v1985_v40 = vpop.permute.xlu0 %308 }
  0xe7   :  { %2701 = vst [vmem:[#allocation16_spill] sm:$0xff] %v1985_v40 }
  0xe8   :  { %235 = vrot.lane.b32.xlu0 %v1798_v33, %s1634_s0 }
  0xe9   :  { %318 = vrot.lane.b32.xlu1 %v1755_v31, %s1636_s11 }
  0xea   :  { %v1991_v54 = vpop.permute.xlu1 %555  ;;  %v1993_v45 = vpop.permute.xlu0 %474 }
  0xec   :  { %401 = vrot.lane.b32.xlu0 %v1710_v28, %s1637_s12 }
  0xed   :  { %484 = vrot.lane.b32.xlu1 %v1696_v26, %s1638_s13 }
  0xee   :  { %v228_v47 = vpop.permute.xlu1 %227  ;;  %v1999_v60 = vpop.permute.xlu0 %557 }
  0xef   :  { %v253_v59 = vsel %vm245_vm2, %v226_v55, %v228_v47 }
  0xf0   :  { %567 = vrot.lane.b32.xlu0 %v1689_v23, %s1639_s14  ;;  %v286_v42 = vmul.f32 %v253_v59, %v1687_v22 }
  0xf1   :  { %650 = vrot.lane.b32.xlu1 %v1687_v22, %s1640_s15 }
  0xf2   :  { %v2005_v17 = vpop.permute.xlu1 %393  ;;  %v311_v62 = vpop.permute.xlu0 %310 }
  0xf3   :  { %v337_v52 = vsel %vm330_vm3, %v1985_v40, %v311_v62 }
  0xf4   :  { %733 = vrot.lane.b32.xlu0 %v1685_v21, %s1641_s16  ;;  %v370_v21 = vmul.f32 %v337_v52, %v285_v25 }
  0xf5   :  { %237 = vrot.lane.b32.xlu1 %v1813_v35, %s1634_s0 }
  0xf6   :  { %v2011_v63 = vpop.permute.xlu1 %559  ;;  %v2013_v1 = vpop.permute.xlu0 %476 }
  0xf8   :  { %320 = vrot.lane.b32.xlu0 %v1798_v33, %s1636_s11 }
  0xf9   :  { %403 = vrot.lane.b32.xlu1 %v1755_v31, %s1637_s12 }
  0xfa   :  { %v2019_v2 = vpop.permute.xlu1 %642  ;;  %v2021_v61 = vpop.permute.xlu0 %640 }
  0xfc   :  { %486 = vrot.lane.b32.xlu0 %v1710_v28, %s1638_s13 }
  0xfd   :  { %569 = vrot.lane.b32.xlu1 %v1696_v26, %s1639_s14 }
  0xfe   :  { %v313_v32 = vpop.permute.xlu1 %312  ;;  %v230_v6 = vpop.permute.xlu0 %229 }
  0xff   :  { %v254_v18 = vsel %vm245_vm2, %v228_v47, %v230_v6  ;;  %v338_v55 = vsel %vm330_vm3, %v311_v62, %v313_v32 }
 0x100   :  { %652 = vrot.lane.b32.xlu0 %v1689_v23, %s1640_s15  ;;  %v287_v49 = vmul.f32 %v254_v18, %v1689_v23  ;;  %v371_v52 = vmul.f32 %v338_v55, %v286_v42 }
 0x101   :  { %735 = vrot.lane.b32.xlu1 %v1687_v22, %s1641_s16 }
 0x102   :  { %v2031_v14 = vpop.permute.xlu1 %478  ;;  %v396_v43 = vpop.permute.xlu0 %395 }
 0x103   :  { %v422_v22 = vsel %vm415_vm4, %v2005_v17, %v396_v43 }
 0x104   :  { %322 = vrot.lane.b32.xlu0 %v1813_v35, %s1636_s11  ;;  %v455_v40 = vmul.f32 %v422_v22, %v370_v21  ;;  %v92_v22 = vmul.f32 %v1663_v4, %v1663_v4 }
 0x105   :  { %405 = vrot.lane.b32.xlu1 %v1798_v33, %s1637_s12 }
 0x106   :  { %v2037_v44 = vpop.permute.xlu1 %644  ;;  %v2039_v48 = vpop.permute.xlu0 %561 }
 0x108   :  { %488 = vrot.lane.b32.xlu0 %v1755_v31, %s1638_s13 }
 0x109   :  { %571 = vrot.lane.b32.xlu1 %v1710_v28, %s1639_s14 }
 0x10a   :  { %v2049_v20 = vpop.permute.xlu1 %727  ;;  %v2051_v7 = vpop.permute.xlu0 %725 }
 0x10c   :  { %654 = vrot.lane.b32.xlu0 %v1696_v26, %s1640_s15 }
 0x10d   :  { %737 = vrot.lane.b32.xlu1 %v1689_v23, %s1641_s16 }
 0x10e   :  { %v2062_v15 = vpop.permute.xlu1 %314  ;;  %v2064_v36 = vpop.permute.xlu0 %231 }
 0x10f   :  { %v339_v47 = vsel %vm330_vm3, %v313_v32, %v2062_v15  ;;  %v2075_v18 = vsel %vm245_vm2, %v230_v6, %v2064_v36  ;;  %v1199_v6 = vlaneseq }
 0x110   :  { %v2079_v25 = vmul.f32 %v339_v47, %v287_v49  ;;  %407 = vrot.lane.b32.xlu0 %v1813_v35, %s1637_s12  ;;  %v333_v47 = vsel %vm330_vm3, %v1951_v27, %v1949_v24 }
 0x111   :  { %490 = vrot.lane.b32.xlu1 %v1798_v33, %s1638_s13  ;;  %v2116_v55 = vand.u32 127, %v1199_v6 }
 0x112   :  { %v2081_v59 = vpop.permute.xlu1 %480  ;;  %v2083_v62 = vpop.permute.xlu0 %397 }
 0x113   :  { %v507_v23 = vsel %vm500_vm5, %v2031_v14, %v2081_v59  ;;  %v423_v49 = vsel %vm415_vm4, %v396_v43, %v2083_v62  ;;  %v2109_v43 = vshrl.u32 %v1199_v6, 7 }
 0x114   :  { %v2094_v32 = vmul.f32 %v507_v23, %v455_v40  ;;  %v2096_v42 = vmul.f32 %v423_v49, %v371_v52  ;;  %573 = vrot.lane.b32.xlu0 %v1755_v31, %s1639_s14  ;;  %v248_v40 = vsel %vm245_vm2, %v1942_v58, %v1947_v30  ;;  %v1643_v52 = vmov 0.0  }
 0x115   :  { %656 = vrot.lane.b32.xlu1 %v1710_v28, %s1640_s15  ;;  %v1212_v21 = vadd.s32 96, %v2109_v43  ;;  %1502 = vmatprep.subr.mxu0 %v1643_v52  ;;  %v249_v49 = vsel %vm245_vm2, %v1947_v30, %v1945_v10  ;;  %v2139_v4 = vadd.s32 88, %v2109_v43 }
 0x116   :  { %1531 = vmatprep.subr.mxu1 %v1643_v52 }
 0x117   :  { %vm1227_vm9 = vcmp.lt.s32.totalorder %v1212_v21, %v2116_v55  ;;  %vm1226_vm11 = vcmp.lt.s32.totalorder %v2139_v4, %v2116_v55  ;;  %vm1330_vm15 = vcmp.ge.s32.totalorder %v1212_v21, %v2116_v55 }
 0x118   :  { %739 = vrot.lane.b32.xlu0 %v1696_v26, %s1641_s16  ;;  %v281_v26 = vmul.f32 %v248_v40, %v1669_v11  ;;  %v1240_v23 = vsel %vm1227_vm9, 1.0, %v1643_v52  ;;  %v247_v11 = vsel %vm245_vm2, %v1834_v39, %v1942_v58  ;;  %v2142_v40 = vadd.s32 80, %v2109_v43 }
 0x119   :  { %492 = vrot.lane.b32.xlu1 %v1813_v35, %s1638_s13  ;;  %1503 = vmatpush3.msk.msra.mxu0 %vm1244_vm10, %v1240_v23  ;;  %v332_v39 = vsel %vm330_vm3, %v1840_v41, %v1951_v27  ;;  %v418_v58 = vsel %vm415_vm4, %v1960_v13, %v1958_v12  ;;  %v280_v30 = vmul.f32 %v247_v11, %v1667_v9  ;;  %v2159_v41 = vadd.s32 72, %v2109_v43 }
 0x11a   :  { %v366_v6 = vmul.f32 %v333_v47, %v281_v26  ;;  %1504 = vmatprep.subr.mxu0 %v1643_v52  ;;  %v282_v26 = vmul.f32 %v249_v49, %v1678_v16  ;;  %v2702_v47 = vmov 1.0   ;;  %vm1225_vm12 = vcmp.lt.s32.totalorder %v2142_v40, %v2116_v55 }
 0x11b   :  { %1505 = vmatpush3.msk.msra.mxu0 %vm1226_vm11, %v2702_v47  ;;  %v334_v27 = vsel %vm330_vm3, %v1949_v24, %v1954_v50  ;;  %v365_v9 = vmul.f32 %v332_v39, %v280_v30  ;;  %v2173_v23 = vadd.s32 64, %v2109_v43  ;;  %v503_v24 = vsel %vm500_vm5, %v1969_v34, %v1977_v37 }
 0x11c   :  { %575 = vrot.lane.b32.xlu0 %v1798_v33, %s1639_s14  ;;  %v451_v16 = vmul.f32 %v418_v58, %v366_v6  ;;  %1506 = vmatprep.subr.mxu0 %v1643_v52  ;;  %vm1224_vm13 = vcmp.lt.s32.totalorder %v2159_v41, %v2116_v55  ;;  %v2188_v49 = vadd.s32 56, %v2109_v43  ;;  %v419_v6 = vsel %vm415_vm4, %v1958_v12, %v1971_v3 }
 0x11d   :  { %658 = vrot.lane.b32.xlu1 %v1755_v31, %s1640_s15  ;;  %1507 = vmatpush3.msk.msra.mxu0 %vm1225_vm12, %v2702_v47  ;;  %vm1223_vm14 = vcmp.lt.s32.totalorder %v2173_v23, %v2116_v55  ;;  %v2203_v39 = vadd.s32 48, %v2109_v43  ;;  %v587_v12 = vsel %vm585_vm6, %v1888_v56, %v1991_v54  ;;  %vm1329_vm10 = vcmp.ge.s32.totalorder %v2139_v4, %v2116_v55 }
 0x11e   :  { %1508 = vmatprep.subr.mxu0 %v1643_v52  ;;  %vm1222_vm9 = vcmp.lt.s32.totalorder %v2188_v49, %v2116_v55  ;;  %v2219_v56 = vadd.s32 40, %v2109_v43  ;;  %vm1328_vm12 = vcmp.ge.s32.totalorder %v2142_v40, %v2116_v55  ;;  %v2234_v4 = vadd.s32 32, %v2109_v43 }
 0x11f   :  { %1509 = vmatpush3.msk.msra.mxu0 %vm1224_vm13, %v2702_v47  ;;  %vm1221_vm11 = vcmp.lt.s32.totalorder %v2203_v39, %v2116_v55 }
 0x120   :  { %741 = vrot.lane.b32.xlu0 %v1710_v28, %s1641_s16  ;;  %v109_v28 = vmul.f32 %v92_v22, %v92_v22  ;;  %v417_v22 = vsel %vm415_vm4, %v1860_v46, %v1960_v13  ;;  %v367_v46 = vmul.f32 %v334_v27, %v282_v26  ;;  %v502_v13 = vsel %vm500_vm5, %v1878_v53, %v1969_v34 }
 0x121   :  { %577 = vrot.lane.b32.xlu1 %v1813_v35, %s1639_s14  ;;  %v536_v53 = vmul.f32 %v503_v24, %v451_v16  ;;  %v1343_v34 = vsel %vm1330_vm15, 1.0, %v1643_v52  ;;  %1510 = vmatprep.subr.mxu0 %v1643_v52  ;;  %vm1220_vm13 = vcmp.lt.s32.totalorder %v2219_v56, %v2116_v55  ;;  %v757_v27 = vsel %vm755_vm8, %v1929_v0, %v2051_v7 }
 0x122   :  { %v2178_v11 = vmul.f32 %v109_v28, %v109_v28  ;;  %1532 = vmatpush3.msk.msra.mxu1 %vm1353_vm1, %v1343_v34  ;;  %v452_v58 = vmul.f32 %v419_v6, %v367_v46  ;;  %1511 = vmatpush3.msk.msra.mxu0 %vm1223_vm14, %v2702_v47  ;;  %v2224_v28 = vpop.permute.xlu0 %563  ;;  %vm1327_vm14 = vcmp.ge.s32.totalorder %v2159_v41, %v2116_v55  ;;  %v2332_v34 = vpop.permute.xlu1 %646 }
 0x123   :  { %1533 = vmatprep.subr.mxu1 %v1643_v52  ;;  %1512 = vmatprep.subr.mxu0 %v1643_v52  ;;  %v758_v0 = vsel %vm755_vm8, %v2051_v7, %v2049_v20  ;;  %vm1219_vm15 = vcmp.lt.s32.totalorder %v2234_v4, %v2116_v55  ;;  %vm1326_vm1 = vcmp.ge.s32.totalorder %v2173_v23, %v2116_v55  ;;  %v2284_v7 = vadd.s32 16, %v2109_v43 }
 0x124   :  { %660 = vrot.lane.b32.xlu0 %v1798_v33, %s1640_s15  ;;  %1513 = vmatpush3.msk.msra.mxu0 %vm1222_vm9, %v2702_v47  ;;  %v674_v23 = vsel %vm670_vm7, %v2019_v2, %v2037_v44  ;;  %v108_v46 = vmul.f32 %v1717_v29, %v1717_v29 }
 0x125   :  { %743 = vrot.lane.b32.xlu1 %v1755_v31, %s1641_s16  ;;  %v450_v31 = vmul.f32 %v417_v22, %v365_v9  ;;  %1534 = vmatpush3.msk.msra.mxu1 %vm1329_vm10, %v2702_v47  ;;  %v107_v22 = vmul.f32 %v1665_v5, %v1665_v5  ;;  %v589_v5 = vsel %vm585_vm6, %v1999_v60, %v2011_v63 }
 0x126   :  { %1514 = vmatprep.subr.mxu0 %v1643_v52  ;;  %1535 = vmatprep.subr.mxu1 %v1643_v52  ;;  %v2286_v16 = vpop.permute.xlu0 %729  ;;  %vm1325_vm10 = vcmp.ge.s32.totalorder %v2188_v49, %v2116_v55 }
 0x127   :  { %v535_v21 = vmul.f32 %v502_v13, %v450_v31  ;;  %1515 = vmatpush3.msk.msra.mxu0 %vm1221_vm11, %v2702_v47  ;;  %1536 = vmatpush3.msk.msra.mxu1 %vm1328_vm12, %v2702_v47  ;;  %vm1217_vm11 = vcmp.lt.s32.totalorder %v2284_v7, %v2116_v55  ;;  %vm1324_vm12 = vcmp.ge.s32.totalorder %v2203_v39, %v2116_v55 }
 0x128   :  { %662 = vrot.lane.b32.xlu0 %v1813_v35, %s1640_s15  ;;  %1516 = vmatprep.subr.mxu0 %v1643_v52  ;;  %v759_v29 = vsel %vm755_vm8, %v2049_v20, %v2286_v16 }
 0x129   :  { %745 = vrot.lane.b32.xlu1 %v1798_v33, %s1641_s16  ;;  %v588_v33 = vsel %vm585_vm6, %v1991_v54, %v1999_v60  ;;  %v504_v54 = vsel %vm500_vm5, %v1977_v37, %v1993_v45  ;;  %v620_v30 = vmul.f32 %v587_v12, %v535_v21  ;;  %v672_v37 = vsel %vm670_vm7, %v1903_v8, %v2021_v61 }
 0x12a   :  { %v621_v26 = vmul.f32 %v588_v33, %v536_v53  ;;  %v537_v8 = vmul.f32 %v504_v54, %v452_v58  ;;  %1537 = vmatprep.subr.mxu1 %v1643_v52  ;;  %1517 = vmatpush3.msk.msra.mxu0 %vm1220_vm13, %v2702_v47  ;;  %v2295_v60 = vadd.s32 8, %v2109_v43  ;;  %v124_v53 = vmul.f32 %v107_v22, %v107_v22  ;;  %v2346_v54 = vpop.permute.xlu1 %233 }
 0x12b   :  { %v705_v41 = vmul.f32 %v672_v37, %v620_v30  ;;  %1538 = vmatpush3.msk.msra.mxu1 %vm1327_vm14, %v2702_v47  ;;  %1518 = vmatprep.subr.mxu0 %v1643_v52  ;;  %vm1323_vm14 = vcmp.ge.s32.totalorder %v2219_v56, %v2116_v55 }
 0x12c   :  { %747 = vrot.lane.b32.xlu0 %v1813_v35, %s1641_s16  ;;  %v673_v35 = vsel %vm670_vm7, %v2021_v61, %v2019_v2  ;;  %v2267_v61 = vadd.s32 24, %v2109_v43  ;;  %1539 = vmatprep.subr.mxu1 %v1643_v52  ;;  %v622_v31 = vmul.f32 %v589_v5, %v537_v8  ;;  %v143_v2 = vmul.f32 %v2178_v11, %v2178_v11 }
 0x12d   :  { %v706_v40 = vmul.f32 %v673_v35, %v621_v26  ;;  %v790_v9 = vmul.f32 %v757_v27, %v705_v41  ;;  %1519 = vmatpush3.msk.msra.mxu0 %vm1219_vm15, %v2702_v47  ;;  %1540 = vmatpush3.msk.msra.mxu1 %vm1326_vm1, %v2702_v47  ;;  %vm1216_vm13 = vcmp.lt.s32.totalorder %v2295_v60, %v2116_v55  ;;  %vm1644_vm1 = vmmov 0  }
 0x12e   :  { %vm1218_vm9 = vcmp.lt.s32.totalorder %v2267_v61, %v2116_v55  ;;  %1520 = vmatprep.subr.mxu0 %v1643_v52  ;;  %1541 = vmatprep.subr.mxu1 %v1643_v52  ;;  %v707_v13 = vmul.f32 %v674_v23, %v622_v31  ;;  %v125_v11 = vmul.f32 %v108_v46, %v108_v46 }
 0x12f   :  { %v791_v24 = vmul.f32 %v758_v0, %v706_v40  ;;  %1521 = vmatpush3.msk.msra.mxu0 %vm1218_vm9, %v2702_v47  ;;  %1542 = vmatpush3.msk.msra.mxu1 %vm1325_vm10, %v2702_v47  ;;  %v807_v49 = vmul.f32 %v790_v9, %v790_v9  ;;  %vm1215_vm15 = vcmp.lt.s32.totalorder %v2109_v43, %v2116_v55 }
 0x130   :  { %1522 = vmatprep.subr.mxu0 %v1643_v52  ;;  %1543 = vmatprep.subr.mxu1 %v1643_v52  ;;  %v792_v20 = vmul.f32 %v759_v29, %v707_v13  ;;  %vm1322_vm9 = vcmp.ge.s32.totalorder %v2234_v4, %v2116_v55  ;;  %v160_v12 = vmul.f32 %v143_v2, %v143_v2 }
 0x131   :  { %v808_v6 = vmul.f32 %v791_v24, %v791_v24  ;;  %1523 = vmatpush3.msk.msra.mxu0 %vm1217_vm11, %v2702_v47  ;;  %1544 = vmatpush3.msk.msra.mxu1 %vm1324_vm12, %v2702_v47  ;;  %v824_v39 = vmul.f32 %v807_v49, %v807_v49  ;;  %v141_v21 = vmul.f32 %v124_v53, %v124_v53 }
 0x132   :  { %1524 = vmatprep.subr.mxu0 %v1643_v52  ;;  %1545 = vmatprep.subr.mxu1 %v1643_v52  ;;  %vm1321_vm10 = vcmp.ge.s32.totalorder %v2267_v61, %v2116_v55  ;;  %v809_v58 = vmul.f32 %v792_v20, %v792_v20  ;;  %v142_v56 = vmul.f32 %v125_v11, %v125_v11 }
 0x133   :  { %1525 = vmatpush3.msk.msra.mxu0 %vm1216_vm13, %v2702_v47  ;;  %1528 = vmatprep.mubr.msk.f32.mxu0 %vm1644_vm1, %v1643_v52  ;;  %v825_v33 = vmul.f32 %v808_v6, %v808_v6  ;;  %vm1320_vm11 = vcmp.ge.s32.totalorder %v2284_v7, %v2116_v55  ;;  %v841_v4 = vmul.f32 %v824_v39, %v790_v9 }
 0x134   :  { %1526 = vmatprep.subr.mxu0 %v1643_v52  ;;  %1546 = vmatpush3.msk.msra.mxu1 %vm1323_vm14, %v2702_v47  ;;  %v858_v30 = vmul.f32 %v824_v39, %v824_v39  ;;  %v177_v26 = vmul.f32 %v160_v12, %v160_v12  ;;  %v158_v8 = vmul.f32 %v141_v21, %v141_v21  ;;  %vm1044_vm14 = vcmask 64512  }
 0x135   :  { %1527 = vmatpush3.msk.msra.mxu0 %vm1215_vm15, %v2702_v47  ;;  %1547 = vmatprep.subr.mxu1 %v1643_v52  ;;  %v842_v37 = vmul.f32 %v825_v33, %v791_v24  ;;  %v859_v35 = vmul.f32 %v825_v33, %v825_v33  ;;  %vm1319_vm12 = vcmp.ge.s32.totalorder %v2295_v60, %v2116_v55 }
 0x136   :  { %1548 = vmatpush3.msk.msra.mxu1 %vm1322_vm9, %v2702_v47  ;;  %1557 = vmatprep.mubr.msk.f32.mxu1 %vm1644_vm1, %v1643_v52  ;;  %v826_v27 = vmul.f32 %v809_v58, %v809_v58  ;;  %v159_v22 = vmul.f32 %v142_v56, %v142_v56  ;;  %vm1318_vm13 = vcmp.ge.s32.totalorder %v2109_v43, %v2116_v55  ;;  %v2369_v55 = vld [vmem:[#allocation2 + $0x20] sm:$0xff] }
 0x137   :  { %1549 = vmatprep.subr.mxu1 %v1643_v52  ;;  %v875_v41 = vmul.f32 %v858_v30, %v841_v4  ;;  %v892_v0 = vmul.f32 %v858_v30, %v858_v30  ;;  %v250_v40 = vsel %vm245_vm2, %v1945_v10, %v1956_v57  ;;  %v876_v7 = vmul.f32 %v859_v35, %v842_v37 }
 0x138   :  { %1550 = vmatpush3.msk.msra.mxu1 %vm1321_vm10, %v2702_v47  ;;  %v893_v9 = vmul.f32 %v859_v35, %v859_v35  ;;  %v175_v60 = vmul.f32 %v158_v8, %v158_v8  ;;  %v843_v23 = vmul.f32 %v826_v27, %v792_v20  ;;  %v860_v24 = vmul.f32 %v826_v27, %v826_v27 }
 0x139   :  { %1551 = vmatprep.subr.mxu1 %v1643_v52  ;;  %v176_v43 = vmul.f32 %v159_v22, %v159_v22  ;;  %v283_v46 = vmul.f32 %v2369_v55, %v250_v40  ;;  %v909_v31 = vmul.f32 %v892_v0, %v875_v41  ;;  %v926_v29 = vmul.f32 %v892_v0, %v892_v0 }
 0x13a   :  { %1552 = vmatpush3.msk.msra.mxu1 %vm1320_vm11, %v2702_v47  ;;  %v910_v2 = vmul.f32 %v893_v9, %v876_v7  ;;  %v927_v13 = vmul.f32 %v893_v9, %v893_v9  ;;  %v877_v49 = vmul.f32 %v860_v24, %v843_v23  ;;  %v894_v6 = vmul.f32 %v860_v24, %v860_v24 }
 0x13b   :  { %1553 = vmatprep.subr.mxu1 %v1643_v52  ;;  %v192_v53 = vmul.f32 %v175_v60, %v175_v60  ;;  %v193_v20 = vmul.f32 %v176_v43, %v176_v43  ;;  %v420_v11 = vsel %vm415_vm4, %v1971_v3, %v1983_v38  ;;  %v943_v33 = vmul.f32 %v926_v29, %v909_v31 }
 0x13c   :  { %1554 = vmatpush3.msk.msra.mxu1 %vm1319_vm12, %v2702_v47  ;;  %v960_v21 = vmul.f32 %v926_v29, %v926_v29  ;;  %v944_v56 = vmul.f32 %v927_v13, %v910_v2  ;;  %v961_v4 = vmul.f32 %v927_v13, %v927_v13  ;;  %v911_v30 = vmul.f32 %v894_v6, %v877_v49  ;;  %v2420_v2 = vld [vmem:[#allocation2 + $0x28] sm:$0xff] }
 0x13d   :  { %1555 = vmatprep.subr.mxu1 %v1643_v52  ;;  %v335_v52 = vsel %vm330_vm3, %v1954_v50, %v1963_v19  ;;  %v505_v22 = vsel %vm500_vm5, %v1993_v45, %v2013_v1  ;;  %v590_v60 = vsel %vm585_vm6, %v2011_v63, %v2039_v48 }
 0x13e   :  { %1556 = vmatpush3.msk.msra.mxu1 %vm1318_vm13, %v2702_v47  ;;  %v368_v47 = vmul.f32 %v335_v52, %v283_v46  ;;  %v977_v0 = vmul.f32 %v960_v21, %v943_v33  ;;  %v978_v40 = vmul.f32 %v961_v4, %v944_v56  ;;  %v251_v46 = vsel %vm245_vm2, %v1956_v57, %v1965_v51 }
 0x13f   :  { %v284_v13 = vmul.f32 %v2420_v2, %v251_v46  ;;  %v591_v56 = vsel %vm585_vm6, %v2039_v48, %v2224_v28 }
 0x140   :  { %v453_v8 = vmul.f32 %v420_v11, %v368_v47 }
 0x142   :  { %v2356_v61 = vpop.permute.xlu1 %1010  ;;  %v538_v23 = vmul.f32 %v505_v22, %v453_v8 }
 0x143   :  { %v1078_v5 = vmul.f32 %v2356_v61, %v177_v26  ;;  %v928_v26 = vmul.f32 %v894_v6, %v894_v6 }
 0x145   :  { %1112 = vrot.lane.b32.xlu1 %v1078_v5, %s1645_s18  ;;  %v945_v7 = vmul.f32 %v928_v26, %v911_v30  ;;  %v962_v9 = vmul.f32 %v928_v26, %v928_v26 }
 0x146   :  { %v2372_v10 = vpop.permute.xlu0 %1038 }
 0x147   :  { %v979_v43 = vmul.f32 %v962_v9, %v945_v7 }
 0x14a   :  { %v1043_v12 = vpop.permute.xlu0 %1042 }
 0x14b   :  { %v1041_v39 = vpop.permute.xlu1 %1040 }
 0x14c   :  { %v1059_v58 = vsel %vm1044_vm14, %v2372_v10, %v1041_v39  ;;  %v1060_v50 = vsel %vm1044_vm14, %v1041_v39, %v1043_v12 }
 0x14d   :  { %v2383_v37 = vmul.f32 %v1059_v58, %v192_v53  ;;  %v2385_v35 = vmul.f32 %v1060_v50, %v193_v20 }
 0x14e   :  { %v2390_v3 = vpop.permute.xlu0 %316 }
 0x14f   :  { %v2387_v27 = vpop.permute.xlu1 %399  ;;  %1344 = vrot.lane.b32.xlu0 %v2383_v37, %s1646_s19  ;;  %1346 = vrot.lane.b32.xlu1 %v2385_v35, %s1646_s19 }
 0x150   :  { %v424_v41 = vsel %vm415_vm4, %v2083_v62, %v2387_v27  ;;  %v623_v62 = vmul.f32 %v590_v60, %v538_v23 }
 0x151   :  { %v2400_v5 = vmul.f32 %v424_v41, %v2079_v25  ;;  %v675_v25 = vsel %vm670_vm7, %v2037_v44, %v2332_v34  ;;  %v2703_v44 = vld [vmem:[#allocation16_spill] sm:$0xff] }
 0x152   :  { %v2408_v45 = vpop.permute.xlu0 %482  ;;  %v708_v63 = vmul.f32 %v675_v25, %v623_v62  ;;  %v336_v6 = vsel %vm330_vm3, %v1963_v19, %v2703_v44  ;;  %v506_v19 = vsel %vm500_vm5, %v2013_v1, %v2031_v14 }
 0x153   :  { %v2405_v24 = vpop.permute.xlu1 %565  ;;  %1012 = vrot.lane.b32.xlu0 %v977_v0, %s1642_s17  ;;  %1014 = vrot.lane.b32.xlu1 %v978_v40, %s1642_s17  ;;  %v369_v51 = vmul.f32 %v336_v6, %v284_v13 }
 0x156   :  { %v649_v29 = vpop.permute.xlu0 %648 }
 0x157   :  { %v732_v31 = vpop.permute.xlu1 %731  ;;  %1016 = vrot.lane.b32.xlu0 %v979_v43, %s1642_s17  ;;  %v676_v8 = vsel %vm670_vm7, %v2332_v34, %v649_v29  ;;  %v592_v34 = vsel %vm585_vm6, %v2224_v28, %v2405_v24 }
 0x158   :  { %v760_v52 = vsel %vm755_vm8, %v2286_v16, %v732_v31  ;;  %v421_v16 = vsel %vm415_vm4, %v1983_v38, %v2005_v17  ;;  %v625_v13 = vmul.f32 %v592_v34, %v2094_v32  ;;  %v508_v32 = vsel %vm500_vm5, %v2081_v59, %v2408_v45 }
 0x159   :  { %v793_v49 = vmul.f32 %v760_v52, %v708_v63  ;;  %v454_v21 = vmul.f32 %v421_v16, %v369_v51 }
 0x15a   :  { %v2428_v57 = vpop.permute.xlu0 %235 }
 0x15b   :  { %v810_v53 = vmul.f32 %v793_v49, %v793_v49  ;;  %v2426_v20 = vpop.permute.xlu1 %318  ;;  %v539_v4 = vmul.f32 %v506_v19, %v454_v21 }
 0x15d   :  { %v827_v47 = vmul.f32 %v810_v53, %v810_v53  ;;  %v624_v22 = vmul.f32 %v591_v56, %v539_v4 }
 0x15e   :  { %v2435_v33 = vpop.permute.xlu0 %401 }
 0x15f   :  { %v844_v11 = vmul.f32 %v827_v47, %v793_v49  ;;  %v861_v39 = vmul.f32 %v827_v47, %v827_v47  ;;  %v2433_v12 = vpop.permute.xlu1 %484  ;;  %v709_v1 = vmul.f32 %v676_v8, %v624_v22 }
 0x161   :  { %v878_v58 = vmul.f32 %v861_v39, %v844_v11  ;;  %v895_v50 = vmul.f32 %v861_v39, %v861_v39 }
 0x162   :  { %v2443_v26 = vpop.permute.xlu0 %567 }
 0x163   :  { %v912_v30 = vmul.f32 %v895_v50, %v878_v58  ;;  %v929_v38 = vmul.f32 %v895_v50, %v895_v50  ;;  %v651_v17 = vpop.permute.xlu1 %650  ;;  %v593_v4 = vsel %vm585_vm6, %v2405_v24, %v2443_v26 }
 0x165   :  { %v946_v41 = vmul.f32 %v929_v38, %v912_v30  ;;  %v963_v0 = vmul.f32 %v929_v38, %v929_v38  ;;  %v541_v30 = vmul.f32 %v508_v32, %v2096_v42  ;;  %v2704_v32 = vld [vmem:[#allocation9_spill] sm:$0xff] }
 0x166   :  { %v734_v40 = vpop.permute.xlu0 %733 }
 0x167   :  { %v2447_v14 = vpop.permute.xlu1 %237  ;;  %v980_v7 = vmul.f32 %v963_v0, %v946_v41  ;;  %v761_v9 = vsel %vm755_vm8, %v732_v31, %v734_v40  ;;  %v677_v31 = vsel %vm670_vm7, %v649_v29, %v651_v17 }
 0x168   :  { %v794_v48 = vmul.f32 %v761_v9, %v709_v1  ;;  %v710_v6 = vmul.f32 %v677_v31, %v625_v13  ;;  %v626_v1 = vmul.f32 %v593_v4, %v541_v30 }
 0x169   :  { %1018 = vrot.lane.b32.xlu1 %v980_v7, %s1642_s17 }
 0x16a   :  { %v811_v60 = vmul.f32 %v794_v48, %v794_v48  ;;  %v2453_v25 = vpop.permute.xlu0 %320 }
 0x16b   :  { %v2451_v23 = vpop.permute.xlu1 %403 }
 0x16c   :  { %v828_v62 = vmul.f32 %v811_v60, %v811_v60 }
 0x16e   :  { %v845_v43 = vmul.f32 %v828_v62, %v794_v48  ;;  %v862_v46 = vmul.f32 %v828_v62, %v828_v62  ;;  %v2460_v52 = vpop.permute.xlu0 %486 }
 0x16f   :  { %v2458_v63 = vpop.permute.xlu1 %569 }
 0x170   :  { %v879_v49 = vmul.f32 %v862_v46, %v845_v43  ;;  %v896_v44 = vmul.f32 %v862_v46, %v862_v46 }
 0x172   :  { %v913_v53 = vmul.f32 %v896_v44, %v879_v49  ;;  %v930_v51 = vmul.f32 %v896_v44, %v896_v44  ;;  %v653_v16 = vpop.permute.xlu0 %652  ;;  %v509_v49 = vsel %vm500_vm5, %v2408_v45, %v2433_v12  ;;  %v256_v44 = vsel %vm245_vm2, %v2064_v36, %v2346_v54 }
 0x173   :  { %v736_v47 = vpop.permute.xlu1 %735  ;;  %v678_v0 = vsel %vm670_vm7, %v651_v17, %v653_v16  ;;  %v341_v45 = vsel %vm330_vm3, %v2390_v3, %v2426_v20  ;;  %v257_v36 = vsel %vm245_vm2, %v2346_v54, %v2428_v57 }
 0x174   :  { %v762_v11 = vsel %vm755_vm8, %v734_v40, %v736_v47  ;;  %v947_v39 = vmul.f32 %v930_v51, %v913_v53  ;;  %v964_v19 = vmul.f32 %v930_v51, %v930_v51  ;;  %v711_v48 = vmul.f32 %v678_v0, %v626_v1  ;;  %v2499_v51 = vld [vmem:[#allocation2 + $0x48] sm:$0xff] }
 0x175   :  { %v795_v28 = vmul.f32 %v762_v11, %v710_v6  ;;  %v340_v6 = vsel %vm330_vm3, %v2062_v15, %v2390_v3  ;;  %v594_v15 = vsel %vm585_vm6, %v2443_v26, %v2458_v63  ;;  %v542_v11 = vmul.f32 %v509_v49, %v2400_v5  ;;  %v2520_v3 = vld [vmem:[#allocation2 + $0x50] sm:$0xff] }
 0x176   :  { %v2467_v50 = vpop.permute.xlu0 %322  ;;  %v981_v29 = vmul.f32 %v964_v19, %v947_v39  ;;  %v289_v54 = vmul.f32 %v2520_v3, %v256_v44  ;;  %v258_v26 = vsel %vm245_vm2, %v2428_v57, %v2447_v14  ;;  %v342_v57 = vsel %vm330_vm3, %v2426_v20, %v2453_v25 }
 0x177   :  { %v812_v21 = vmul.f32 %v795_v28, %v795_v28  ;;  %v2465_v58 = vpop.permute.xlu1 %405  ;;  %v510_v20 = vsel %vm500_vm5, %v2433_v12, %v2460_v52 }
 0x178   :  { %1020 = vrot.lane.b32.xlu0 %v981_v29, %s1642_s17 }
 0x179   :  { %v829_v56 = vmul.f32 %v812_v21, %v812_v21 }
 0x17a   :  { %v2479_v41 = vpop.permute.xlu0 %488 }
 0x17b   :  { %v846_v38 = vmul.f32 %v829_v56, %v795_v28  ;;  %v863_v8 = vmul.f32 %v829_v56, %v829_v56  ;;  %v2477_v22 = vpop.permute.xlu1 %571  ;;  %v425_v28 = vsel %vm415_vm4, %v2387_v27, %v2435_v33  ;;  %v259_v27 = vsel %vm245_vm2, %v2447_v14, %v2704_v32  ;;  %v2706_v32 = vld [vmem:[#allocation11_spill] sm:$0xff] }
 0x17c   :  { %v627_v56 = vmul.f32 %v594_v15, %v542_v11  ;;  %v595_v12 = vsel %vm585_vm6, %v2458_v63, %v2477_v22  ;;  %vm1241_vm2 = vcmask 826368  }
 0x17d   :  { %v880_v40 = vmul.f32 %v863_v8, %v846_v38  ;;  %v897_v59 = vmul.f32 %v863_v8, %v863_v8  ;;  %v374_v38 = vmul.f32 %v341_v45, %v289_v54  ;;  %v2531_v8 = vld [vmem:[#allocation2 + $0x58] sm:$0xff] }
 0x17e   :  { %v2482_v62 = vpop.permute.xlu0 %654  ;;  %v290_v0 = vmul.f32 %v2531_v8, %v257_v36 }
 0x17f   :  { %v914_v7 = vmul.f32 %v897_v59, %v880_v40  ;;  %v931_v9 = vmul.f32 %v897_v59, %v897_v59  ;;  %v738_v60 = vpop.permute.xlu1 %737  ;;  %v679_v5 = vsel %vm670_vm7, %v653_v16, %v2482_v62 }
 0x180   :  { %v763_v24 = vsel %vm755_vm8, %v736_v47, %v738_v60  ;;  %v288_v47 = vmul.f32 %v2499_v51, %v2075_v18  ;;  %v712_v16 = vmul.f32 %v679_v5, %v627_v56  ;;  %v375_v44 = vmul.f32 %v342_v57, %v290_v0 }
 0x181   :  { %v796_v42 = vmul.f32 %v763_v24, %v711_v48  ;;  %v948_v34 = vmul.f32 %v931_v9, %v914_v7  ;;  %v965_v43 = vmul.f32 %v931_v9, %v931_v9  ;;  %v2537_v48 = vld [vmem:[#allocation2 + $0x60] sm:$0xff]  ;;  %v2540_v24 = vld [vmem:[#allocation2 + $0x68] sm:$0xff] }
 0x182   :  { %v2487_v13 = vpop.permute.xlu0 %407  ;;  %v373_v29 = vmul.f32 %v340_v6, %v288_v47  ;;  %v291_v14 = vmul.f32 %v2537_v48, %v258_v26  ;;  %v343_v6 = vsel %vm330_vm3, %v2453_v25, %v2467_v50 }
 0x183   :  { %v813_v46 = vmul.f32 %v796_v42, %v796_v42  ;;  %v2485_v31 = vpop.permute.xlu1 %490  ;;  %v982_v17 = vmul.f32 %v965_v43, %v948_v34  ;;  %v426_v34 = vsel %vm415_vm4, %v2435_v33, %v2451_v23 }
 0x184   :  { %v458_v1 = vmul.f32 %v425_v28, %v373_v29  ;;  %v459_v47 = vmul.f32 %v426_v34, %v374_v38  ;;  %v512_v25 = vsel %vm500_vm5, %v2479_v41, %v2485_v31 }
 0x185   :  { %v830_v53 = vmul.f32 %v813_v46, %v813_v46  ;;  %1022 = vrot.lane.b32.xlu1 %v982_v17, %s1642_s17  ;;  %v427_v46 = vsel %vm415_vm4, %v2451_v23, %v2465_v58  ;;  %v511_v23 = vsel %vm500_vm5, %v2460_v52, %v2479_v41  ;;  %v428_v52 = vsel %vm415_vm4, %v2465_v58, %v2487_v13 }
 0x186   :  { %v2518_v21 = vpop.permute.xlu0 %573  ;;  %v543_v11 = vmul.f32 %v510_v20, %v458_v1  ;;  %v460_v28 = vmul.f32 %v427_v46, %v375_v44  ;;  %v544_v26 = vmul.f32 %v511_v23, %v459_v47 }
 0x187   :  { %v847_v39 = vmul.f32 %v830_v53, %v796_v42  ;;  %v864_v18 = vmul.f32 %v830_v53, %v830_v53  ;;  %v2516_v19 = vpop.permute.xlu1 %656  ;;  %v292_v42 = vmul.f32 %v2540_v24, %v259_v27  ;;  %v2705_v53 = vld [vmem:[#allocation10_spill] sm:$0xff]  ;;  %v596_v5 = vsel %vm585_vm6, %v2477_v22, %v2518_v21 }
 0x188   :  { %v344_v33 = vsel %vm330_vm3, %v2467_v50, %v2705_v53  ;;  %v680_v63 = vsel %vm670_vm7, %v2482_v62, %v2516_v19  ;;  %v628_v29 = vmul.f32 %v595_v12, %v543_v11  ;;  %v545_v41 = vmul.f32 %v512_v25, %v460_v28 }
 0x189   :  { %v881_v4 = vmul.f32 %v864_v18, %v847_v39  ;;  %v898_v30 = vmul.f32 %v864_v18, %v864_v18  ;;  %v376_v39 = vmul.f32 %v343_v6, %v291_v14  ;;  %v377_v18 = vmul.f32 %v344_v33, %v292_v42  ;;  %v2707_v14 = vld [vmem:[#allocation12_spill] sm:$0xff] }
 0x18a   :  { %v740_v9 = vpop.permute.xlu0 %739  ;;  %v429_v27 = vsel %vm415_vm4, %v2487_v13, %v2706_v32  ;;  %v713_v38 = vmul.f32 %v680_v63, %v628_v29  ;;  %v629_v57 = vmul.f32 %v596_v5, %v544_v26  ;;  %vm1348_vm3 = vcmask 326656  }
 0x18b   :  { %v915_v40 = vmul.f32 %v898_v30, %v881_v4  ;;  %v932_v59 = vmul.f32 %v898_v30, %v898_v30  ;;  %v493_v7 = vpop.permute.xlu1 %492  ;;  %v764_v43 = vsel %vm755_vm8, %v738_v60, %v740_v9  ;;  %v461_v1 = vmul.f32 %v428_v52, %v376_v39  ;;  %v2709_v52 = vld [vmem:[#allocation14_spill] sm:$0xff] }
 0x18c   :  { %v797_v17 = vmul.f32 %v764_v43, %v712_v16  ;;  %v513_v0 = vsel %vm500_vm5, %v2485_v31, %v493_v7  ;;  %v462_v16 = vmul.f32 %v429_v27, %v377_v18  ;;  %v514_v13 = vsel %vm500_vm5, %v493_v7, %v2707_v14 }
 0x18d   :  { %v949_v49 = vmul.f32 %v932_v59, %v915_v40  ;;  %v966_v60 = vmul.f32 %v932_v59, %v932_v59  ;;  %v546_v43 = vmul.f32 %v513_v0, %v461_v1  ;;  %v2710_v1 = vld [vmem:[#allocation15_spill] sm:$0xff]  ;;  %vm1350_vm4 = vcmask 818176  }
 0x18e   :  { %v814_v45 = vmul.f32 %v797_v17, %v797_v17  ;;  %v576_v15 = vpop.permute.xlu0 %575  ;;  %v547_v47 = vmul.f32 %v514_v13, %v462_v16  ;;  %vm1146_vm5 = vcmask 982016  }
 0x18f   :  { %v659_v36 = vpop.permute.xlu1 %658  ;;  %v983_v50 = vmul.f32 %v966_v60, %v949_v49  ;;  %v597_v42 = vsel %vm585_vm6, %v2518_v21, %v576_v15  ;;  %v2708_v21 = vld [vmem:[#allocation13_spill] sm:$0xff] }
 0x190   :  { %v831_v54 = vmul.f32 %v814_v45, %v814_v45  ;;  %v681_v58 = vsel %vm670_vm7, %v2516_v19, %v659_v36  ;;  %v630_v53 = vmul.f32 %v597_v42, %v545_v41 }
 0x191   :  { %1024 = vrot.lane.b32.xlu0 %v983_v50, %s1642_s17  ;;  %v714_v46 = vmul.f32 %v681_v58, %v629_v57 }
 0x192   :  { %v848_v56 = vmul.f32 %v831_v54, %v797_v17  ;;  %v865_v62 = vmul.f32 %v831_v54, %v831_v54  ;;  %v742_v30 = vpop.permute.xlu0 %741 }
 0x193   :  { %v578_v4 = vpop.permute.xlu1 %577  ;;  %v765_v22 = vsel %vm755_vm8, %v740_v9, %v742_v30 }
 0x194   :  { %v882_v40 = vmul.f32 %v865_v62, %v848_v56  ;;  %v899_v59 = vmul.f32 %v865_v62, %v865_v62  ;;  %v798_v34 = vmul.f32 %v765_v22, %v713_v38  ;;  %v598_v9 = vsel %vm585_vm6, %v576_v15, %v578_v4 }
 0x195   :  { %v599_v12 = vsel %vm585_vm6, %v578_v4, %v2708_v21  ;;  %v631_v45 = vmul.f32 %v598_v9, %v546_v43 }
 0x196   :  { %v916_v20 = vmul.f32 %v899_v59, %v882_v40  ;;  %v933_v31 = vmul.f32 %v899_v59, %v899_v59  ;;  %v661_v19 = vpop.permute.xlu0 %660  ;;  %v815_v49 = vmul.f32 %v798_v34, %v798_v34  ;;  %v632_v54 = vmul.f32 %v599_v12, %v547_v47 }
 0x197   :  { %v744_v17 = vpop.permute.xlu1 %743  ;;  %v682_v6 = vsel %vm670_vm7, %v659_v36, %v661_v19 }
 0x198   :  { %v766_v44 = vsel %vm755_vm8, %v742_v30, %v744_v17  ;;  %v950_v7 = vmul.f32 %v933_v31, %v916_v20  ;;  %v967_v60 = vmul.f32 %v933_v31, %v933_v31  ;;  %v832_v23 = vmul.f32 %v815_v49, %v815_v49 }
 0x199   :  { %v799_v33 = vmul.f32 %v766_v44, %v714_v46  ;;  %v715_v28 = vmul.f32 %v682_v6, %v630_v53 }
 0x19a   :  { %v663_v50 = vpop.permute.xlu0 %662  ;;  %v984_v15 = vmul.f32 %v967_v60, %v950_v7  ;;  %v849_v39 = vmul.f32 %v832_v23, %v798_v34  ;;  %v866_v18 = vmul.f32 %v832_v23, %v832_v23 }
 0x19b   :  { %v816_v11 = vmul.f32 %v799_v33, %v799_v33  ;;  %v746_v25 = vpop.permute.xlu1 %745  ;;  %v683_v36 = vsel %vm670_vm7, %v661_v19, %v663_v50  ;;  %v684_v5 = vsel %vm670_vm7, %v663_v50, %v2709_v52 }
 0x19c   :  { %v767_v63 = vsel %vm755_vm8, %v744_v17, %v746_v25  ;;  %1026 = vrot.lane.b32.xlu1 %v984_v15, %s1642_s17  ;;  %v883_v41 = vmul.f32 %v866_v18, %v849_v39  ;;  %v900_v32 = vmul.f32 %v866_v18, %v866_v18  ;;  %v716_v27 = vmul.f32 %v683_v36, %v631_v45 }
 0x19d   :  { %v833_v29 = vmul.f32 %v816_v11, %v816_v11  ;;  %v800_v26 = vmul.f32 %v767_v63, %v715_v28  ;;  %v717_v30 = vmul.f32 %v684_v5, %v632_v54 }
 0x19e   :  { %v748_v38 = vpop.permute.xlu0 %747  ;;  %v917_v0 = vmul.f32 %v900_v32, %v883_v41  ;;  %v934_v58 = vmul.f32 %v900_v32, %v900_v32 }
 0x19f   :  { %v850_v56 = vmul.f32 %v833_v29, %v799_v33  ;;  %v867_v62 = vmul.f32 %v833_v29, %v833_v29  ;;  %v817_v4 = vmul.f32 %v800_v26, %v800_v26  ;;  %v768_v22 = vsel %vm755_vm8, %v746_v25, %v748_v38 }
 0x1a0   :  { %v769_v57 = vsel %vm755_vm8, %v748_v38, %v2710_v1  ;;  %v801_v14 = vmul.f32 %v768_v22, %v716_v27  ;;  %v951_v42 = vmul.f32 %v934_v58, %v917_v0  ;;  %v968_v34 = vmul.f32 %v934_v58, %v934_v58  ;;  %v1582_v27 = vld [vmem:[#allocation2 + $0x8] sm:$0xff]  ;;  %v1584_v22 = vld [vmem:[#allocation2 + $0x18] sm:$0xff] }
 0x1a1   :  { %v884_v40 = vmul.f32 %v867_v62, %v850_v56  ;;  %v901_v59 = vmul.f32 %v867_v62, %v867_v62  ;;  %v834_v16 = vmul.f32 %v817_v4, %v817_v4  ;;  %v802_v13 = vmul.f32 %v769_v57, %v717_v30  ;;  %v1583_v62 = vld [vmem:[#allocation2 + $0x10] sm:$0xff] }
 0x1a2   :  { %v818_v17 = vmul.f32 %v801_v14, %v801_v14  ;;  %v985_v9 = vmul.f32 %v968_v34, %v951_v42  ;;  %v93_v56 = vmul.f32 %v1582_v27, %v1582_v27  ;;  %v94_v4 = vmul.f32 %v1583_v62, %v1583_v62 }
 0x1a3   :  { %v918_v43 = vmul.f32 %v901_v59, %v884_v40  ;;  %v935_v20 = vmul.f32 %v901_v59, %v901_v59  ;;  %v851_v31 = vmul.f32 %v834_v16, %v800_v26  ;;  %v868_v46 = vmul.f32 %v834_v16, %v834_v16 }
 0x1a4   :  { %v819_v19 = vmul.f32 %v802_v13, %v802_v13  ;;  %v835_v33 = vmul.f32 %v818_v17, %v818_v17  ;;  %1028 = vrot.lane.b32.xlu0 %v985_v9, %s1642_s17  ;;  %v110_v0 = vmul.f32 %v93_v56, %v93_v56  ;;  %v111_v58 = vmul.f32 %v94_v4, %v94_v4  ;;  %v1586_v4 = vld [vmem:[#allocation2 + $0x38] sm:$0xff] }
 0x1a5   :  { %v885_v49 = vmul.f32 %v868_v46, %v851_v31  ;;  %v902_v44 = vmul.f32 %v868_v46, %v868_v46  ;;  %v952_v6 = vmul.f32 %v935_v20, %v918_v43  ;;  %v969_v53 = vmul.f32 %v935_v20, %v935_v20 }
 0x1a6   :  { %v836_v7 = vmul.f32 %v819_v19, %v819_v19  ;;  %v852_v12 = vmul.f32 %v835_v33, %v801_v14  ;;  %v869_v45 = vmul.f32 %v835_v33, %v835_v33  ;;  %v95_v1 = vmul.f32 %v1584_v22, %v1584_v22 }
 0x1a7   :  { %v919_v60 = vmul.f32 %v902_v44, %v885_v49  ;;  %v936_v47 = vmul.f32 %v902_v44, %v902_v44  ;;  %v986_v21 = vmul.f32 %v969_v53, %v952_v6  ;;  %v127_v40 = vmul.f32 %v110_v0, %v110_v0 }
 0x1a8   :  { %v853_v23 = vmul.f32 %v836_v7, %v802_v13  ;;  %v870_v11 = vmul.f32 %v836_v7, %v836_v7  ;;  %v886_v50 = vmul.f32 %v869_v45, %v852_v12  ;;  %v903_v39 = vmul.f32 %v869_v45, %v869_v45 }
 0x1a9   :  { %1030 = vrot.lane.b32.xlu1 %v986_v21, %s1642_s17  ;;  %v953_v28 = vmul.f32 %v936_v47, %v919_v60  ;;  %v970_v25 = vmul.f32 %v936_v47, %v936_v47  ;;  %v128_v59 = vmul.f32 %v111_v58, %v111_v58  ;;  %v112_v16 = vmul.f32 %v95_v1, %v95_v1 }
 0x1aa   :  { %v887_v15 = vmul.f32 %v870_v11, %v853_v23  ;;  %v904_v18 = vmul.f32 %v870_v11, %v870_v11  ;;  %v920_v36 = vmul.f32 %v903_v39, %v886_v50  ;;  %v937_v29 = vmul.f32 %v903_v39, %v903_v39 }
 0x1ab   :  { %v987_v63 = vmul.f32 %v970_v25, %v953_v28  ;;  %v144_v14 = vmul.f32 %v127_v40, %v127_v40  ;;  %v145_v13 = vmul.f32 %v128_v59, %v128_v59  ;;  %v129_v42 = vmul.f32 %v112_v16, %v112_v16  ;;  %v1587_v16 = vld [vmem:[#allocation2 + $0x40] sm:$0xff] }
 0x1ac   :  { %v921_v54 = vmul.f32 %v904_v18, %v887_v15  ;;  %v938_v26 = vmul.f32 %v904_v18, %v904_v18  ;;  %v954_v41 = vmul.f32 %v937_v29, %v920_v36  ;;  %v971_v32 = vmul.f32 %v937_v29, %v937_v29  ;;  %v1585_v29 = vld [vmem:[#allocation2 + $0x30] sm:$0xff] }
 0x1ad   :  { %1032 = vrot.lane.b32.xlu0 %v987_v63, %s1642_s17  ;;  %v161_v34 = vmul.f32 %v144_v14, %v144_v14  ;;  %v162_v43 = vmul.f32 %v145_v13, %v145_v13  ;;  %v146_v20 = vmul.f32 %v129_v42, %v129_v42  ;;  %v96_v53 = vmul.f32 %v2369_v55, %v2369_v55 }
 0x1ae   :  { %v955_v52 = vmul.f32 %v938_v26, %v921_v54  ;;  %v972_v5 = vmul.f32 %v938_v26, %v938_v26  ;;  %v988_v38 = vmul.f32 %v971_v32, %v954_v41  ;;  %v98_v26 = vmul.f32 %v1585_v29, %v1585_v29 }
 0x1af   :  { %v178_v19 = vmul.f32 %v161_v34, %v161_v34  ;;  %v179_v9 = vmul.f32 %v162_v43, %v162_v43  ;;  %v163_v49 = vmul.f32 %v146_v20, %v146_v20  ;;  %v113_v23 = vmul.f32 %v96_v53, %v96_v53 }
 0x1b0   :  { %v989_v30 = vmul.f32 %v972_v5, %v955_v52  ;;  %1034 = vrot.lane.b32.xlu1 %v988_v38, %s1642_s17  ;;  %v115_v5 = vmul.f32 %v98_v26, %v98_v26  ;;  %v100_v14 = vmul.f32 %v1587_v16, %v1587_v16 }
 0x1b1   :  { %v180_v21 = vmul.f32 %v163_v49, %v163_v49  ;;  %v130_v55 = vmul.f32 %v113_v23, %v113_v23 }
 0x1b2   :  { %1036 = vrot.lane.b32.xlu0 %v989_v30, %s1642_s17  ;;  %v132_v32 = vmul.f32 %v115_v5, %v115_v5  ;;  %v99_v30 = vmul.f32 %v1586_v4, %v1586_v4  ;;  %v117_v42 = vmul.f32 %v100_v14, %v100_v14 }
 0x1b3   :  { %v147_v28 = vmul.f32 %v130_v55, %v130_v55 }
 0x1b4   :  { %v149_v62 = vmul.f32 %v132_v32, %v132_v32  ;;  %v116_v0 = vmul.f32 %v99_v30, %v99_v30  ;;  %v134_v43 = vmul.f32 %v117_v42, %v117_v42 }
 0x1b5   :  { %v164_v25 = vmul.f32 %v147_v28, %v147_v28 }
 0x1b6   :  { %v166_v38 = vmul.f32 %v149_v62, %v149_v62  ;;  %v133_v22 = vmul.f32 %v116_v0, %v116_v0 }
 0x1b7   :  { %v2608_v57 = vpop.permute.xlu1 %1112  ;;  %v181_v50 = vmul.f32 %v164_v25, %v164_v25 }
 0x1b8   :  { %1529 = vmatmul.mubr.msk.f32.vlgmr.msra.gmra.mxu0 %vm1241_vm2, %v2608_v57  ;;  %v183_v58 = vmul.f32 %v166_v38, %v166_v38  ;;  %v150_v13 = vmul.f32 %v133_v22, %v133_v22 }
 0x1ba   :  { %v167_v34 = vmul.f32 %v150_v13, %v150_v13 }
 0x1bc   :  { %v184_v20 = vmul.f32 %v167_v34, %v167_v34 }
 0x1c1   :  { %v1345_v31 = vpop.permute.xlu0 %1344  ;;  %v1347_v46 = vpop.permute.xlu1 %1346 }
 0x1c2   :  { %v1349_v17 = vsel %vm1348_vm3, %v1345_v31, %v1347_v46  ;;  %v101_v31 = vmul.f32 %v2499_v51, %v2499_v51 }
 0x1c3   :  { %1558 = vmatmul.mubr.msk.f32.vlgmr.msra.gmra.mxu1 %vm1350_vm4, %v1349_v17 }
 0x1c5   :  { %v1013_v44 = vpop.permute.xlu0 %1012  ;;  %v1015_v6 = vpop.permute.xlu1 %1014 }
 0x1c6   :  { %v1045_v33 = vsel %vm1044_vm14, %v2356_v61, %v1013_v44  ;;  %v1046_v7 = vsel %vm1044_vm14, %v1013_v44, %v1015_v6  ;;  %v97_v61 = vmul.f32 %v2420_v2, %v2420_v2  ;;  %v118_v44 = vmul.f32 %v101_v31, %v101_v31 }
 0x1c7   :  { %v1079_v60 = vmul.f32 %v1045_v33, %v178_v19  ;;  %v1080_v47 = vmul.f32 %v1046_v7, %v179_v9  ;;  %v151_v19 = vmul.f32 %v134_v43, %v134_v43  ;;  %v102_v9 = vmul.f32 %v2520_v3, %v2520_v3 }
 0x1c8   :  { %v114_v15 = vmul.f32 %v97_v61, %v97_v61  ;;  %v103_v33 = vmul.f32 %v2531_v8, %v2531_v8  ;;  %v135_v7 = vmul.f32 %v118_v44, %v118_v44  ;;  %v105_v3 = vmul.f32 %v2540_v24, %v2540_v24  ;;  %v1588_v61 = vld [vmem:[#allocation2 + $0x70] sm:$0xff] }
 0x1c9   :  { %v1017_v12 = vpop.permute.xlu0 %1016  ;;  %1114 = vrot.lane.b32.xlu1 %v1079_v60, %s1645_s18  ;;  %1116 = vrot.lane.b32.xlu0 %v1080_v47, %s1645_s18  ;;  %v119_v53 = vmul.f32 %v102_v9, %v102_v9  ;;  %v106_v8 = vmul.f32 %v1588_v61, %v1588_v61 }
 0x1ca   :  { %v1047_v45 = vsel %vm1044_vm14, %v1015_v6, %v1017_v12  ;;  %v131_v36 = vmul.f32 %v114_v15, %v114_v15  ;;  %v168_v6 = vmul.f32 %v151_v19, %v151_v19  ;;  %v120_v51 = vmul.f32 %v103_v33, %v103_v33 }
 0x1cb   :  { %v1081_v11 = vmul.f32 %v1047_v45, %v180_v21  ;;  %v136_v47 = vmul.f32 %v119_v53, %v119_v53  ;;  %v152_v21 = vmul.f32 %v135_v7, %v135_v7  ;;  %v122_v15 = vmul.f32 %v105_v3, %v105_v3 }
 0x1cc   :  { %v148_v54 = vmul.f32 %v131_v36, %v131_v36  ;;  %v185_v60 = vmul.f32 %v168_v6, %v168_v6  ;;  %v137_v28 = vmul.f32 %v120_v51, %v120_v51 }
 0x1cd   :  { %1118 = vrot.lane.b32.xlu1 %v1081_v11, %s1645_s18  ;;  %v153_v55 = vmul.f32 %v136_v47, %v136_v47  ;;  %v169_v25 = vmul.f32 %v152_v21, %v152_v21 }
 0x1ce   :  { %v165_v52 = vmul.f32 %v148_v54, %v148_v54  ;;  %v139_v54 = vmul.f32 %v122_v15, %v122_v15 }
 0x1d0   :  { %v182_v41 = vmul.f32 %v165_v52, %v165_v52 }
 0x1db   :  { %v1019_v39 = vpop.permute.xlu1 %1018 }
 0x1dc   :  { %v1048_v18 = vsel %vm1044_vm14, %v1017_v12, %v1019_v39  ;;  %v104_v12 = vmul.f32 %v2537_v48, %v2537_v48  ;;  %v123_v48 = vmul.f32 %v106_v8, %v106_v8 }
 0x1dd   :  { %v1082_v63 = vmul.f32 %v1048_v18, %v181_v50  ;;  %v154_v18 = vmul.f32 %v137_v28, %v137_v28 }
 0x1de   :  { %v121_v50 = vmul.f32 %v104_v12, %v104_v12 }
 0x1df   :  { %1120 = vrot.lane.b32.xlu0 %v1082_v63, %s1645_s18  ;;  %v186_v63 = vmul.f32 %v169_v25, %v169_v25  ;;  %v171_v52 = vmul.f32 %v154_v18, %v154_v18 }
 0x1e0   :  { %v138_v36 = vmul.f32 %v121_v50, %v121_v50 }
 0x1e1   :  { %v188_v4 = vmul.f32 %v171_v52, %v171_v52 }
 0x1e2   :  { %v155_v32 = vmul.f32 %v138_v36, %v138_v36 }
 0x1e4   :  { %v172_v38 = vmul.f32 %v155_v32, %v155_v32 }
 0x1ea   :  { %v1021_v27 = vpop.permute.xlu0 %1020 }
 0x1eb   :  { %v1049_v56 = vsel %vm1044_vm14, %v1019_v39, %v1021_v27  ;;  %v170_v39 = vmul.f32 %v153_v55, %v153_v55 }
 0x1ec   :  { %v1083_v2 = vmul.f32 %v1049_v56, %v182_v41  ;;  %v140_v41 = vmul.f32 %v123_v48, %v123_v48 }
 0x1ed   :  { %v187_v26 = vmul.f32 %v170_v39, %v170_v39 }
 0x1ee   :  { %1122 = vrot.lane.b32.xlu1 %v1083_v2, %s1645_s18  ;;  %v157_v30 = vmul.f32 %v140_v41, %v140_v41 }
 0x1f7   :  { %v1023_v1 = vpop.permute.xlu1 %1022 }
 0x1f8   :  { %v1050_v40 = vsel %vm1044_vm14, %v1021_v27, %v1023_v1  ;;  %v156_v27 = vmul.f32 %v139_v54, %v139_v54 }
 0x1f9   :  { %v1084_v59 = vmul.f32 %v1050_v40, %v183_v58  ;;  %v174_v40 = vmul.f32 %v157_v30, %v157_v30 }
 0x1fa   :  { %v173_v0 = vmul.f32 %v156_v27, %v156_v27 }
 0x1fb   :  { %1124 = vrot.lane.b32.xlu0 %v1084_v59, %s1645_s18  ;;  %v189_v59 = vmul.f32 %v172_v38, %v172_v38  ;;  %v191_v43 = vmul.f32 %v174_v40, %v174_v40 }
 0x1fc   :  { %v190_v16 = vmul.f32 %v173_v0, %v173_v0 }
 0x203   :  { %v1025_v46 = vpop.permute.xlu0 %1024 }
 0x204   :  { %v1051_v17 = vsel %vm1044_vm14, %v1023_v1, %v1025_v46 }
 0x205   :  { %v1085_v49 = vmul.f32 %v1051_v17, %v184_v20 }
 0x207   :  { %1126 = vrot.lane.b32.xlu1 %v1085_v49, %s1645_s18 }
 0x20e   :  { %v1027_v23 = vpop.permute.xlu1 %1026 }
 0x20f   :  { %v1052_v45 = vsel %vm1044_vm14, %v1025_v46, %v1027_v23 }
 0x210   :  { %v1086_v11 = vmul.f32 %v1052_v45, %v185_v60 }
 0x212   :  { %1128 = vrot.lane.b32.xlu0 %v1086_v11, %s1645_s18 }
 0x216   :  { %v1029_v24 = vpop.permute.xlu0 %1028 }
 0x217   :  { %v1053_v29 = vsel %vm1044_vm14, %v1027_v23, %v1029_v24 }
 0x218   :  { %v1087_v5 = vmul.f32 %v1053_v29, %v186_v63 }
 0x21a   :  { %1130 = vrot.lane.b32.xlu1 %v1087_v5, %s1645_s18 }
 0x21b   :  { %v1031_v56 = vpop.permute.xlu1 %1030 }
 0x21c   :  { %v1054_v2 = vsel %vm1044_vm14, %v1029_v24, %v1031_v56 }
 0x21d   :  { %v1088_v62 = vmul.f32 %v1054_v2, %v187_v26 }
 0x21f   :  { %v1033_v58 = vpop.permute.xlu0 %1032  ;;  %1132 = vrot.lane.b32.xlu0 %v1088_v62, %s1645_s18 }
 0x220   :  { %v1055_v22 = vsel %vm1044_vm14, %v1031_v56, %v1033_v58 }
 0x221   :  { %v1089_v1 = vmul.f32 %v1055_v22, %v188_v4 }
 0x222   :  { %v1035_v13 = vpop.permute.xlu1 %1034 }
 0x223   :  { %1134 = vrot.lane.b32.xlu1 %v1089_v1, %s1645_s18  ;;  %v1056_v42 = vsel %vm1044_vm14, %v1033_v58, %v1035_v13 }
 0x224   :  { %v1037_v14 = vpop.permute.xlu0 %1036  ;;  %v1090_v20 = vmul.f32 %v1056_v42, %v189_v59 }
 0x225   :  { %v1057_v34 = vsel %vm1044_vm14, %v1035_v13, %v1037_v14  ;;  %v1058_v46 = vsel %vm1044_vm14, %v1037_v14, %v2372_v10 }
 0x226   :  { %v1091_v31 = vmul.f32 %v1057_v34, %v190_v16  ;;  %1136 = vrot.lane.b32.xlu0 %v1090_v20, %s1645_s18  ;;  %v1092_v17 = vmul.f32 %v1058_v46, %v191_v43 }
 0x228   :  { %1138 = vrot.lane.b32.xlu1 %v1091_v31, %s1645_s18 }
 0x22a   :  { %1140 = vrot.lane.b32.xlu0 %v1092_v17, %s1645_s18 }
 0x22c   :  { %1142 = vrot.lane.b32.xlu1 %v2383_v37, %s1645_s18 }
 0x22e   :  { %1144 = vrot.lane.b32.xlu0 %v2385_v35, %s1645_s18 }
 0x23b   :  { %v1115_v49 = vpop.permute.xlu1 %1114  ;;  %v1117_v44 = vpop.permute.xlu0 %1116 }
 0x23c   :  { %v1147_v53 = vsel %vm1146_vm5, %v2608_v57, %v1115_v49  ;;  %v1148_v33 = vsel %vm1146_vm5, %v1115_v49, %v1117_v44 }
 0x23d   :  { %v1180_v47 = vadd.f32 %v1148_v33, %v1147_v53 }
 0x23f   :  { %v1119_v10 = vpop.permute.xlu1 %1118 }
 0x240   :  { %v1149_v37 = vsel %vm1146_vm5, %v1117_v44, %v1119_v10 }
 0x241   :  { %v1181_v21 = vadd.f32 %v1180_v47, %v1149_v37 }
 0x251   :  { %v1121_v60 = vpop.permute.xlu0 %1120 }
 0x252   :  { %v1150_v35 = vsel %vm1146_vm5, %v1119_v10, %v1121_v60 }
 0x253   :  { %v1182_v23 = vadd.f32 %v1181_v21, %v1150_v35 }
 0x260   :  { %v1123_v51 = vpop.permute.xlu1 %1122 }
 0x261   :  { %v1151_v3 = vsel %vm1146_vm5, %v1121_v60, %v1123_v51 }
 0x262   :  { %v1183_v55 = vadd.f32 %v1182_v23, %v1151_v3 }
 0x26d   :  { %v1125_v12 = vpop.permute.xlu0 %1124 }
 0x26e   :  { %v1152_v11 = vsel %vm1146_vm5, %v1123_v51, %v1125_v12 }
 0x26f   :  { %v1184_v25 = vadd.f32 %v1183_v55, %v1152_v11 }
 0x278   :  { %v1314_v19 = vpop.f32.mrf.mxu0 }
 0x279   :  { %v1127_v45 = vpop.permute.xlu1 %1126 }
 0x27a   :  { %v1530_v9 = vpop.f32.mrf.mxu0  ;;  %v1153_v28 = vsel %vm1146_vm5, %v1125_v12, %v1127_v45 }
 0x27b   :  { %v1185_v50 = vadd.f32 %v1184_v25, %v1153_v28 }
 0x283   :  { %v1423_v6 = vpop.f32.mrf.mxu1 }
 0x284   :  { %v1129_v57 = vpop.permute.xlu0 %1128 }
 0x285   :  { %v1559_v7 = vpop.f32.mrf.mxu1  ;;  %v1154_v8 = vsel %vm1146_vm5, %v1127_v45, %v1129_v57 }
 0x286   :  { %v1186_v18 = vadd.f32 %v1185_v50, %v1154_v8 }
 0x28c   :  { %v1131_v61 = vpop.permute.xlu1 %1130 }
 0x28d   :  { %v1155_v39 = vsel %vm1146_vm5, %v1129_v57, %v1131_v61 }
 0x28e   :  { %v1187_v36 = vadd.f32 %v1186_v18, %v1155_v39 }
 0x291   :  { %v1133_v15 = vpop.permute.xlu0 %1132 }
 0x292   :  { %v1156_v63 = vsel %vm1146_vm5, %v1131_v61, %v1133_v15 }
 0x293   :  { %v1188_v24 = vadd.f32 %v1187_v36, %v1156_v63 }
 0x295   :  { %v1135_v48 = vpop.permute.xlu1 %1134 }
 0x296   :  { %v1157_v54 = vsel %vm1146_vm5, %v1133_v15, %v1135_v48 }
 0x297   :  { %v1189_v29 = vadd.f32 %v1188_v24, %v1157_v54 }
 0x298   :  { %v1137_v26 = vpop.permute.xlu0 %1136 }
 0x299   :  { %v1158_v5 = vsel %vm1146_vm5, %v1135_v48, %v1137_v26 }
 0x29a   :  { %v1139_v52 = vpop.permute.xlu1 %1138  ;;  %v1190_v41 = vadd.f32 %v1189_v29, %v1158_v5 }
 0x29b   :  { %v1159_v32 = vsel %vm1146_vm5, %v1137_v26, %v1139_v52 }
 0x29c   :  { %v1191_v27 = vadd.f32 %v1190_v41, %v1159_v32  ;;  %v1141_v56 = vpop.permute.xlu0 %1140 }
 0x29d   :  { %v1160_v62 = vsel %vm1146_vm5, %v1139_v52, %v1141_v56 }
 0x29e   :  { %v1143_v2 = vpop.permute.xlu1 %1142  ;;  %v1192_v4 = vadd.f32 %v1191_v27, %v1160_v62 }
 0x29f   :  { %v1161_v30 = vsel %vm1146_vm5, %v1141_v56, %v1143_v2 }
 0x2a0   :  { %v1193_v38 = vadd.f32 %v1192_v4, %v1161_v30  ;;  %v1145_v0 = vpop.permute.xlu0 %1144 }
 0x2a1   :  { %v1162_v58 = vsel %vm1146_vm5, %v1143_v2, %v1145_v0  ;;  %v1195_v1 = vsel %vm71_vm0, %v1145_v0, 0.0 }
 0x2a2   :  { %v1194_v22 = vadd.f32 %v1193_v38, %v1162_v58 }
 0x2a4   :  { %v1196_v40 = vadd.f32 %v1195_v1, %v1194_v22 }
 0x2a6   :  { %1197 = vadd.xlane.f32.xlu1 %v1196_v40 }
 0x32f   :  { %v1198_v59 = vpop.xlane.xlu1 %1197 }
 0x330   :  { %v1427_v16 = vsub.f32 %v1198_v59, %v1314_v19 }
 0x332   :  { %v1428_v14 = vsub.f32 %v1427_v16, %v1423_v6 }
 0x334   :  { %v1429_v13 = vmul.f32 0.0005, %v1428_v14 }
 0x336   :  { %1430 = vst.msk [vmem:[#allocation6] sm:$0xff] %vm1241_vm2, %v1429_v13 }
 0x337   :  { %1620 = shalt.err (!%p1617_p9)
}
 0x338   :  { %1440 = dma.vmem_to_hbm [thread:$0]  %s1438_s21, 128, %s2683_s1, [#allocation5]  }
 0x339   :  { %1631 = dma.done.wait [#allocation5], 128  }
 0x33a   :  { %1632 = vsyncadd [#allocation5], 4294967168 }
 0x33b   :  { %1444 = vsyncpa [#allocation4], 1 }
 0x33c   :  { %1445 = vsyncpa [#allocation5], 1 }

</bundles_post_ra>
